<compile_context>
chip_gen: v7x
topology: tpu7x:2x2x1
jax: 0.10.0
libtpu: 0.0.40
codegen_flags: <defaults>
</compile_context>

<pallas_src>
import jax
import jax.numpy as jnp
from jax import lax
from jax.experimental import pallas as pl
from jax.experimental.pallas import tpu as pltpu

BN_EPS = 1e-5
LRELU_SLOPE = 0.2


# ----------------------------------------------------------------------------
# Generation-aware VMEM limit (~48 MiB on v7x, 96 MiB on v5e/v6e)
# ----------------------------------------------------------------------------
def _vmem_limit_bytes():
    cap = 128 * 1024 * 1024
    try:
        fn = getattr(pltpu, "get_tpu_info", None)
        if fn is not None:
            info = fn()
            cap = int(getattr(info, "vmem_capacity_bytes", cap) or cap)
    except Exception:
        pass
    return int(min(96 * 1024 * 1024, (cap * 3) // 4))


def _pick_rows(h, bytes_per_row, n_outer, target_bytes, min_steps=8):
    """Largest row tile (a divisor of h) whose block fits `target_bytes`, preferring a
    tile that still leaves >= min_steps grid steps for pipelining / megacore split."""
    divs = [d for d in range(1, h + 1) if h % d == 0]
    fits = [d for d in divs if d * bytes_per_row <= target_bytes] or divs[:1]
    steps_ok = [d for d in fits if n_outer * (h // d) >= min_steps]
    return steps_ok[-1] if steps_ok else fits[-1]


# ----------------------------------------------------------------------------
# Pallas kernel 1: single K=9*Cin sub-pixel conv matmul + BN partial statistics
# ----------------------------------------------------------------------------
def _upconv_mm_kernel(x_ref, w_ref, z_ref, st_ref):
    # x_ref : (1, TH, W+2, 3*Cin) bf16  row-triple-interleaved, width-padded input
    # w_ref : (9*Cin, 4*Cout)     bf16  fused sub-pixel conv weights (resident)
    # z_ref : (1, TH, W, 4*Cout)  bf16  pre-BN phase-channel output
    # st_ref: (1, 1, 2, 4*Cout)   f32   per-block [sum, sum_sq] for BatchNorm
    th = x_ref.shape[1]
    w = x_ref.shape[2] - 2
    kc9 = w_ref.shape[0]

    xt = x_ref[0]                                               # (TH, W+2, 3*Cin)
    # Column taps concatenated once in VMEM -> one fat K = 9*Cin MXU contraction.
    lhs = jnp.concatenate(
        [xt[:, 0:w, :], xt[:, 1:w + 1, :], xt[:, 2:w + 2, :]], axis=-1)
    acc = jnp.dot(lhs.reshape(th * w, kc9), w_ref[...],
                  preferred_element_type=jnp.float32)           # (TH*W, 4*Cout) f32

    # BatchNorm partial statistics from the f32 accumulator (before the bf16 cast).
    st_ref[0, 0, 0:1, :] = jnp.sum(acc, axis=0, keepdims=True)
    st_ref[0, 0, 1:2, :] = jnp.sum(acc * acc, axis=0, keepdims=True)

    z_ref[0] = acc.reshape(th, w, acc.shape[1]).astype(z_ref.dtype)


# ----------------------------------------------------------------------------
# Pallas kernel 2: BatchNorm affine (precomputed scale/shift) + LeakyReLU(0.2)
# ----------------------------------------------------------------------------
def _bn_act_kernel(z_ref, sc_ref, sh_ref, o_ref):
    # z_ref: (1, TH2, W, 4*Cout) bf16; sc/sh: (1, 4*Cout) f32; o_ref: f32
    y = z_ref[0].astype(jnp.float32) * sc_ref[...] + sh_ref[...]
    o_ref[0] = jnp.where(y >= 0.0, y, LRELU_SLOPE * y)


# ----------------------------------------------------------------------------
# Weight preparation: ConvTranspose2d(Cin,Cout,4,4) -> fused sub-pixel 3x3 weights
#   z[n,p,q, ph*Cout+co] = sum_{u,v,ci} xp[n,p+u,q+v,ci] * W3[u,v,ci,ph*Cout+co]
#   with ph = 2*py+px, ky = 3+py-2u, kx = 3+px-2v (taps outside [0,4) are zero).
#   Returned as (9*Cin, 4*Cout) with K laid out (v, u, ci) to match the kernel's lhs.
# ----------------------------------------------------------------------------
def _subpixel_weight(wt):
    cin, cout = wt.shape[0], wt.shape[1]
    w3 = jnp.zeros((3, 3, cin, 4 * cout), wt.dtype)
    for py in range(2):
        for px in range(2):
            ph = 2 * py + px
            for u in range(3):
                ky = 3 + py - 2 * u
                if ky < 0 or ky > 3:
                    continue
                for v in range(3):
                    kx = 3 + px - 2 * v
                    if kx < 0 or kx > 3:
                        continue
                    w3 = w3.at[u, v, :, ph * cout:(ph + 1) * cout].set(wt[:, :, ky, kx])
    return jnp.transpose(w3, (1, 0, 2, 3)).reshape(9 * cin, 4 * cout)


# ----------------------------------------------------------------------------
# Forward pass of the `upconv` module
# ----------------------------------------------------------------------------
def upconv_forward(params, x_nchw):
    wt = params["w"]
    gamma, beta = params["gamma"], params["beta"]
    # NOTE: the ConvTranspose bias is intentionally unused: a per-channel constant
    # added before BatchNorm is exactly cancelled by BN's mean subtraction.

    N, Cin, H, W = x_nchw.shape
    Cout = wt.shape[1]
    CO4 = 4 * Cout
    KC3 = 3 * Cin
    KC9 = 9 * Cin
    vmem = _vmem_limit_bytes()

    # ---- glue: NCHW -> NHWC (bf16 first), pad by 1, 3-row interleave ----------------
    x = jnp.transpose(x_nchw, (0, 2, 3, 1)).astype(jnp.bfloat16)
    xp = jnp.pad(x, ((0, 0), (1, 1), (1, 1), (0, 0)))
    xr = jnp.concatenate([xp[:, u:u + H, :, :] for u in range(3)], axis=-1)
    # xr: (N, H, W+2, 3*Cin) -- row taps folded into channels, so row tiling needs no halo

    w9 = _subpixel_weight(wt).astype(jnp.bfloat16)              # (9*Cin, 4*Cout)

    # ---- call 1: one K=9*Cin matmul per block + BN partial stats --------------------
    k1_row_bytes = (W + 2) * KC3 * 2 + W * CO4 * 2 + 8 * CO4
    TH1 = _pick_rows(H, k1_row_bytes, N, target_bytes=4 << 20)
    T1 = H // TH1
    z, st = pl.pallas_call(
        _upconv_mm_kernel,
        out_shape=(jax.ShapeDtypeStruct((N, H, W, CO4), jnp.bfloat16),
                   jax.ShapeDtypeStruct((N, T1, 2, CO4), jnp.float32)),
        grid=(N, T1),
        in_specs=[pl.BlockSpec((1, TH1, W + 2, KC3), lambda n, r: (n, r, 0, 0)),
                  pl.BlockSpec((KC9, CO4), lambda n, r: (0, 0))],   # weights resident
        out_specs=(pl.BlockSpec((1, TH1, W, CO4), lambda n, r: (n, r, 0, 0)),
                   pl.BlockSpec((1, 1, 2, CO4), lambda n, r: (n, r, 0, 0))),
        compiler_params=pltpu.CompilerParams(
            dimension_semantics=("parallel", "parallel"), vmem_limit_bytes=vmem),
    )(xr, w9)

    # ---- BN finalize: tiny cross-tile reduction in plain JAX ------------------------
    s = st[:, :, 0, :].sum(axis=(0, 1)).reshape(4, Cout).sum(axis=0)
    sq = st[:, :, 1, :].sum(axis=(0, 1)).reshape(4, Cout).sum(axis=0)
    cnt = float(N * H * W * 4)                                   # = N * (2H) * (2W)
    mean = s / cnt
    var = jnp.maximum(sq / cnt - mean * mean, 0.0)               # biased variance
    scale = gamma * lax.rsqrt(var + BN_EPS)
    shift = beta - mean * scale
    sc_row = jnp.tile(scale, 4).reshape(1, CO4).astype(jnp.float32)
    sh_row = jnp.tile(shift, 4).reshape(1, CO4).astype(jnp.float32)

    # ---- call 2: BN affine + LeakyReLU, bf16 in / f32 out, row-tiled ----------------
    k2_row_bytes = W * CO4 * (2 + 4)
    TH2 = _pick_rows(H, k2_row_bytes, N, target_bytes=2 << 20)
    y = pl.pallas_call(
        _bn_act_kernel,
        out_shape=jax.ShapeDtypeStruct((N, H, W, CO4), jnp.float32),
        grid=(N, H // TH2),
        in_specs=[pl.BlockSpec((1, TH2, W, CO4), lambda n, r: (n, r, 0, 0)),
                  pl.BlockSpec((1, CO4), lambda n, r: (0, 0)),
                  pl.BlockSpec((1, CO4), lambda n, r: (0, 0))],
        out_specs=pl.BlockSpec((1, TH2, W, CO4), lambda n, r: (n, r, 0, 0)),
        compiler_params=pltpu.CompilerParams(
            dimension_semantics=("parallel", "parallel"), vmem_limit_bytes=vmem),
    )(z, sc_row, sh_row)

    # ---- tail: pixel shuffle + NCHW folded into ONE transpose (reshapes are free) ---
    y6 = y.reshape(N, H, W, 2, 2, Cout)                          # (n, p, q, py, px, co)
    out = jnp.transpose(y6, (0, 5, 1, 3, 2, 4))                  # (n, co, p, py, q, px)
    return out.reshape(N, Cout, 2 * H, 2 * W)                    # NCHW


# ----------------------------------------------------------------------------
# Pure-JAX f32 reference (lax.conv_general_dilated) for verification
# ----------------------------------------------------------------------------
def upconv_forward_ref(params, x_nchw):
    wt, b = params["w"], params["b"]
    gamma, beta = params["gamma"], params["beta"]
    x = jnp.transpose(x_nchw, (0, 2, 3, 1))
    hwio = jnp.transpose(wt[:, :, ::-1, ::-1], (2, 3, 0, 1))     # flipped -> HWIO
    y = lax.conv_general_dilated(
        x, hwio, window_strides=(1, 1), padding=((2, 2), (2, 2)),
        lhs_dilation=(2, 2), dimension_numbers=("NHWC", "HWIO", "NHWC"),
        precision=lax.Precision.HIGHEST) + b
    m = y.mean(axis=(0, 1, 2))
    v = ((y - m) ** 2).mean(axis=(0, 1, 2))
    y = (y - m) * lax.rsqrt(v + BN_EPS) * gamma + beta
    y = jnp.where(y >= 0.0, y, LRELU_SLOPE * y)
    return jnp.transpose(y, (0, 3, 1, 2))


# ----------------------------------------------------------------------------
if __name__ == "__main__":
    key = jax.random.PRNGKey(0)
    kx, kw, kb, kg, kc = jax.random.split(key, 5)

    N, Cin, Cout, H, W = 2, 32, 16, 16, 16
    x = jax.random.normal(kx, (N, Cin, H, W), jnp.float32)
    params = dict(
        w=0.02 * jax.random.normal(kw, (Cin, Cout, 4, 4), jnp.float32),  # ConvT weight
        b=0.02 * jax.random.normal(kb, (Cout,), jnp.float32),
        gamma=1.0 + 0.1 * jax.random.normal(kg, (Cout,), jnp.float32),
        beta=0.1 * jax.random.normal(kc, (Cout,), jnp.float32),
    )

    fwd = jax.jit(lambda xx: upconv_forward(params, xx))
    out = jax.block_until_ready(fwd(x))
    assert out.shape == (N, Cout, 2 * H, 2 * W), out.shape

    ref = jax.block_until_ready(upconv_forward_ref(params, x))
    max_err = float(jnp.max(jnp.abs(out - ref)))
    # bf16 matmul operands + bf16 z intermediate vs f32 HIGHEST-precision reference.
    assert max_err < 5e-2, f"max abs err {max_err}"

    print("KERNEL_OK")
</pallas_src>

<mosaic_0001>
module attributes {stable_mosaic.version = 11 : i64} {
  func.func @_upconv_mm_kernel(%arg0: i32, %arg1: i32, %arg2: memref<1x4x18x96xbf16, #tpu.memory_space<vmem>>, %arg3: memref<288x64xbf16, #tpu.memory_space<vmem>>, %arg4: memref<1x4x16x64xbf16, #tpu.memory_space<vmem>>, %arg5: memref<1x1x2x64xf32, #tpu.memory_space<vmem>>) attributes {dimension_semantics = [#tpu.dimension_semantics<parallel>, #tpu.dimension_semantics<parallel>], iteration_bounds = array<i64: 2, 4>, scalar_prefetch = 0 : i64, scratch_operands = 0 : i64, tpu.core_type = #tpu.core_type<tc>, window_params = [{transform_indices = @transform_0, window_bounds = array<i64: 1, 4, 18, 96>}, {pipeline_mode = #tpu.pipeline_mode<synchronous>, transform_indices = @transform_1, window_bounds = array<i64: 288, 64>}, {transform_indices = @transform_2, window_bounds = array<i64: 1, 4, 16, 64>}, {transform_indices = @transform_3, window_bounds = array<i64: 1, 1, 2, 64>}]} {
    %c0 = arith.constant 0 : index
    %c0_0 = arith.constant 0 : index
    %c0_1 = arith.constant 0 : index
    %c0_2 = arith.constant 0 : index
    %0 = vector.load %arg2[%c0, %c0_0, %c0_1, %c0_2] : memref<1x4x18x96xbf16, #tpu.memory_space<vmem>>, vector<1x4x18x96xbf16>
    %1 = vector.shape_cast %0 : vector<1x4x18x96xbf16> to vector<4x18x96xbf16>
    %2 = vector.extract_strided_slice %1 {offsets = [0, 0, 0], sizes = [4, 16, 96], strides = [1, 1, 1]} : vector<4x18x96xbf16> to vector<4x16x96xbf16>
    %3 = vector.extract_strided_slice %1 {offsets = [0, 1, 0], sizes = [4, 16, 96], strides = [1, 1, 1]} : vector<4x18x96xbf16> to vector<4x16x96xbf16>
    %4 = vector.extract_strided_slice %1 {offsets = [0, 2, 0], sizes = [4, 16, 96], strides = [1, 1, 1]} : vector<4x18x96xbf16> to vector<4x16x96xbf16>
    %5 = tpu.concatenate %2, %3, %4 in 2 : vector<4x16x96xbf16>, vector<4x16x96xbf16>, vector<4x16x96xbf16> -> vector<4x16x288xbf16>
    %6 = vector.shape_cast %5 : vector<4x16x288xbf16> to vector<64x288xbf16>
    %c0_3 = arith.constant 0 : index
    %c0_4 = arith.constant 0 : index
    %7 = vector.load %arg3[%c0_3, %c0_4] : memref<288x64xbf16, #tpu.memory_space<vmem>>, vector<288x64xbf16>
    %cst = arith.constant dense<0.000000e+00> : vector<64x64xf32>
    %8 = tpu.matmul %6, %7, %cst {dimension_numbers = #tpu.dot_dimension_numbers<[1], [0], [0], [1], [0, 0, 1, 1], [], []>} : vector<64x288xbf16>, vector<288x64xbf16>, vector<64x64xf32> -> vector<64x64xf32>
    %cst_5 = arith.constant dense<0.000000e+00> : vector<64xf32>
    %9 = vector.multi_reduction <add>, %8, %cst_5 [0] : vector<64x64xf32> to vector<64xf32>
    %10 = vector.shape_cast %9 : vector<64xf32> to vector<1x64xf32>
    %c0_6 = arith.constant 0 : index
    %c0_7 = arith.constant 0 : index
    %c0_8 = arith.constant 0 : index
    %c0_9 = arith.constant 0 : index
    %11 = vector.load %arg5[%c0_6, %c0_7, %c0_8, %c0_9] : memref<1x1x2x64xf32, #tpu.memory_space<vmem>>, vector<1x1x1x64xf32>
    %12 = vector.shape_cast %11 : vector<1x1x1x64xf32> to vector<1x64xf32>
    %13 = vector.shape_cast %10 : vector<1x64xf32> to vector<1x1x1x64xf32>
    tpu.vector_store %arg5[%c0_6, %c0_7, %c0_8, %c0_9], %13 {strides = array<i32>} : memref<1x1x2x64xf32, #tpu.memory_space<vmem>>, vector<1x1x1x64xf32>,
    %14 = arith.mulf %8, %8 : vector<64x64xf32>
    %cst_10 = arith.constant dense<0.000000e+00> : vector<64xf32>
    %15 = vector.multi_reduction <add>, %14, %cst_10 [0] : vector<64x64xf32> to vector<64xf32>
    %16 = vector.shape_cast %15 : vector<64xf32> to vector<1x64xf32>
    %c0_11 = arith.constant 0 : index
    %c0_12 = arith.constant 0 : index
    %c1 = arith.constant 1 : index
    %c0_13 = arith.constant 0 : index
    %17 = vector.load %arg5[%c0_11, %c0_12, %c1, %c0_13] : memref<1x1x2x64xf32, #tpu.memory_space<vmem>>, vector<1x1x1x64xf32>
    %18 = vector.shape_cast %17 : vector<1x1x1x64xf32> to vector<1x64xf32>
    %19 = vector.shape_cast %16 : vector<1x64xf32> to vector<1x1x1x64xf32>
    tpu.vector_store %arg5[%c0_11, %c0_12, %c1, %c0_13], %19 {strides = array<i32>} : memref<1x1x2x64xf32, #tpu.memory_space<vmem>>, vector<1x1x1x64xf32>,
    %20 = vector.shape_cast %8 : vector<64x64xf32> to vector<4x16x64xf32>
    %21 = arith.truncf %20 : vector<4x16x64xf32> to vector<4x16x64xbf16>
    %c0_14 = arith.constant 0 : index
    %c0_15 = arith.constant 0 : index
    %c0_16 = arith.constant 0 : index
    %c0_17 = arith.constant 0 : index
    %22 = vector.load %arg4[%c0_14, %c0_15, %c0_16, %c0_17] : memref<1x4x16x64xbf16, #tpu.memory_space<vmem>>, vector<1x4x16x64xbf16>
    %23 = vector.shape_cast %22 : vector<1x4x16x64xbf16> to vector<4x16x64xbf16>
    %24 = vector.shape_cast %21 : vector<4x16x64xbf16> to vector<1x4x16x64xbf16>
    tpu.vector_store %arg4[%c0_14, %c0_15, %c0_16, %c0_17], %24 {strides = array<i32>} : memref<1x4x16x64xbf16, #tpu.memory_space<vmem>>, vector<1x4x16x64xbf16>,
    return
  }
  func.func @transform_0(%arg0: i32, %arg1: i32) -> (i32, i32, i32, i32) {
    %c0_i32 = arith.constant 0 : i32
    %c0_i32_0 = arith.constant 0 : i32
    %c0_i32_1 = arith.constant 0 : i32
    return %arg0, %arg1, %c0_i32, %c0_i32_0 : i32, i32, i32, i32
  }
  func.func @transform_1(%arg0: i32, %arg1: i32) -> (i32, i32) {
    %c0_i32 = arith.constant 0 : i32
    %c0_i32_0 = arith.constant 0 : i32
    %c0_i32_1 = arith.constant 0 : i32
    return %c0_i32, %c0_i32_0 : i32, i32
  }
  func.func @transform_2(%arg0: i32, %arg1: i32) -> (i32, i32, i32, i32) {
    %c0_i32 = arith.constant 0 : i32
    %c0_i32_0 = arith.constant 0 : i32
    %c0_i32_1 = arith.constant 0 : i32
    return %arg0, %arg1, %c0_i32, %c0_i32_0 : i32, i32, i32, i32
  }
  func.func @transform_3(%arg0: i32, %arg1: i32) -> (i32, i32, i32, i32) {
    %c0_i32 = arith.constant 0 : i32
    %c0_i32_0 = arith.constant 0 : i32
    %c0_i32_1 = arith.constant 0 : i32
    return %arg0, %arg1, %c0_i32, %c0_i32_0 : i32, i32, i32, i32
  }
}

module attributes {stable_mosaic.version = 11 : i64} {
  func.func @_bn_act_kernel(%arg0: i32, %arg1: i32, %arg2: memref<1x4x16x64xbf16, #tpu.memory_space<vmem>>, %arg3: memref<1x64xf32, #tpu.memory_space<vmem>>, %arg4: memref<1x64xf32, #tpu.memory_space<vmem>>, %arg5: memref<1x4x16x64xf32, #tpu.memory_space<vmem>>) attributes {dimension_semantics = [#tpu.dimension_semantics<parallel>, #tpu.dimension_semantics<parallel>], iteration_bounds = array<i64: 2, 4>, scalar_prefetch = 0 : i64, scratch_operands = 0 : i64, tpu.core_type = #tpu.core_type<tc>, window_params = [{transform_indices = @transform_0, window_bounds = array<i64: 1, 4, 16, 64>}, {pipeline_mode = #tpu.pipeline_mode<synchronous>, transform_indices = @transform_1, window_bounds = array<i64: 1, 64>}, {pipeline_mode = #tpu.pipeline_mode<synchronous>, transform_indices = @transform_2, window_bounds = array<i64: 1, 64>}, {transform_indices = @transform_3, window_bounds = array<i64: 1, 4, 16, 64>}]} {
    %c0 = arith.constant 0 : index
    %c0_0 = arith.constant 0 : index
    %c0_1 = arith.constant 0 : index
    %c0_2 = arith.constant 0 : index
    %0 = vector.load %arg2[%c0, %c0_0, %c0_1, %c0_2] : memref<1x4x16x64xbf16, #tpu.memory_space<vmem>>, vector<1x4x16x64xbf16>
    %1 = vector.shape_cast %0 : vector<1x4x16x64xbf16> to vector<4x16x64xbf16>
    %2 = arith.extf %1 : vector<4x16x64xbf16> to vector<4x16x64xf32>
    %c0_3 = arith.constant 0 : index
    %c0_4 = arith.constant 0 : index
    %3 = vector.load %arg3[%c0_3, %c0_4] : memref<1x64xf32, #tpu.memory_space<vmem>>, vector<1x64xf32>
    %4 = vector.shape_cast %3 : vector<1x64xf32> to vector<1x1x64xf32>
    %5 = vector.broadcast %4 : vector<1x1x64xf32> to vector<4x16x64xf32>
    %6 = arith.mulf %2, %5 : vector<4x16x64xf32>
    %c0_5 = arith.constant 0 : index
    %c0_6 = arith.constant 0 : index
    %7 = vector.load %arg4[%c0_5, %c0_6] : memref<1x64xf32, #tpu.memory_space<vmem>>, vector<1x64xf32>
    %8 = vector.shape_cast %7 : vector<1x64xf32> to vector<1x1x64xf32>
    %9 = vector.broadcast %8 : vector<1x1x64xf32> to vector<4x16x64xf32>
    %10 = arith.addf %6, %9 : vector<4x16x64xf32>
    %cst = arith.constant 0.000000e+00 : f32
    %11 = vector.broadcast %cst : f32 to vector<4x16x64xf32>
    %12 = arith.cmpf oge, %10, %11 : vector<4x16x64xf32>
    %cst_7 = arith.constant 2.000000e-01 : f32
    %13 = vector.broadcast %cst_7 : f32 to vector<4x16x64xf32>
    %14 = arith.mulf %13, %10 : vector<4x16x64xf32>
    %15 = arith.select %12, %10, %14 : vector<4x16x64xi1>, vector<4x16x64xf32>
    %c0_8 = arith.constant 0 : index
    %c0_9 = arith.constant 0 : index
    %c0_10 = arith.constant 0 : index
    %c0_11 = arith.constant 0 : index
    %16 = vector.load %arg5[%c0_8, %c0_9, %c0_10, %c0_11] : memref<1x4x16x64xf32, #tpu.memory_space<vmem>>, vector<1x4x16x64xf32>
    %17 = vector.shape_cast %16 : vector<1x4x16x64xf32> to vector<4x16x64xf32>
    %18 = vector.shape_cast %15 : vector<4x16x64xf32> to vector<1x4x16x64xf32>
    tpu.vector_store %arg5[%c0_8, %c0_9, %c0_10, %c0_11], %18 {strides = array<i32>} : memref<1x4x16x64xf32, #tpu.memory_space<vmem>>, vector<1x4x16x64xf32>,
    return
  }
  func.func @transform_0(%arg0: i32, %arg1: i32) -> (i32, i32, i32, i32) {
    %c0_i32 = arith.constant 0 : i32
    %c0_i32_0 = arith.constant 0 : i32
    %c0_i32_1 = arith.constant 0 : i32
    return %arg0, %arg1, %c0_i32, %c0_i32_0 : i32, i32, i32, i32
  }
  func.func @transform_1(%arg0: i32, %arg1: i32) -> (i32, i32) {
    %c0_i32 = arith.constant 0 : i32
    %c0_i32_0 = arith.constant 0 : i32
    %c0_i32_1 = arith.constant 0 : i32
    return %c0_i32, %c0_i32_0 : i32, i32
  }
  func.func @transform_2(%arg0: i32, %arg1: i32) -> (i32, i32) {
    %c0_i32 = arith.constant 0 : i32
    %c0_i32_0 = arith.constant 0 : i32
    %c0_i32_1 = arith.constant 0 : i32
    return %c0_i32, %c0_i32_0 : i32, i32
  }
  func.func @transform_3(%arg0: i32, %arg1: i32) -> (i32, i32, i32, i32) {
    %c0_i32 = arith.constant 0 : i32
    %c0_i32_0 = arith.constant 0 : i32
    %c0_i32_1 = arith.constant 0 : i32
    return %arg0, %arg1, %c0_i32, %c0_i32_0 : i32, i32, i32, i32
  }
}

</mosaic_0001>

<bundles_post_ra>
// kernel: tile.18
= control target key start
LH: loop header
LB: loop body
LE: loop exit
PB: predicated region body
PF: predicated region fallthrough
CT: control target
= control target key end

     0   :  { %s22_s0 = inlined_call_operand.vmem [shape: f32[16], index: 0, kind: input, shape index: {}]   ;;  %s23_s1 = inlined_call_operand.vmem [shape: f32[4,16], index: 1, kind: output, shape index: {}]  }
   0x1   :  { %v4_v0 = vld [vmem:[%s22_s0] ss:$0 sm:$0xff] }
   0x2   :  { %5 = vst [vmem:[%s23_s1] sm:$0xf] %v4_v0 }

// kernel: tile.19
= control target key start
LH: loop header
LB: loop body
LE: loop exit
PB: predicated region body
PF: predicated region fallthrough
CT: control target
= control target key end

     0   :  { %s101_s0 = inlined_call_operand.vmem [shape: f32[4,16], index: 0, kind: input, shape index: {}]   ;;  %s102_s1 = inlined_call_operand.hbm [shape: f32[1,64], index: 1, kind: output, shape index: {}]  }
   0x1   :  { %v5_v0 = vld [vmem:[%s101_s0] sm:$0xf] }
   0x2   :  { %6 = vst [vmem:[#allocation3] sm:$0xf] %v5_v0 }
   0x3   :  { %2 = vsyncpa [#allocation1], 0  ;;  %vm8_vm0 = vcmask 130048   ;;  %s72_s0 = smov 48   ;;  %s73_s8 = smov 16   ;;  %vm14_vm1 = vcmask 523648  }
   0x4   :  { %s74_s9 = smov 32   ;;  %vm20_vm2 = vcmask 392448   ;;  %vm26_vm3 = vcmask 261248   ;;  %s75_s10 = smov [#allocation0]  }
   0x5   :  { %s38_s11 = sshll.u32 %s75_s10, 4  ;;  %s39_s11 = int_to_ptr.vmem [resolvable:$true] %s38_s11 }
   0x6   :  { %s48_s12 = scalar_lea.vmem %s39_s11, 16  ;;  %s52_s13 = scalar_lea.vmem %s39_s11, 32 }
   0x7   :  { %p49_p0 = scmp.ne.s32.totalorder %s39_s11, %s48_s12  ;;  %p53_p1 = scmp.lt.s32.totalorder %s39_s11, %s39_s11 }
   0x8   :  { %p54_p2 = scmp.lt.s32.totalorder %s52_s13, %s48_s12 }
   0x9   :  { %v11_v1 = vld [vmem:[#allocation3 + $0x3] sm:$0x1]   ;;  %v23_v2 = vld [vmem:[#allocation3 + $0x1] sm:$0x1]   ;;  %v7_v3 = vld [vmem:[#allocation3] sm:$0x1]  }
   0xa   :  { %12 = vrot.lane.b32.xlu0 %v11_v1, %s72_s0  ;;  %24 = vrot.lane.b32.xlu1 %v23_v2, %s73_s8  ;;  %v17_v4 = vld [vmem:[#allocation3 + $0x2] sm:$0x1]   ;;  %9 = vst.msk [vmem:[#allocation2] sm:$0x1] %vm8_vm0, %v7_v3   ;;  %p55_p3 = por %p54_p2, %p53_p1 }
   0xc   :  { %p56_p4 = pnand %p55_p3, %p49_p0 }
   0xe   :  { %18 = vrot.lane.b32.xlu0 %v17_v4, %s74_s9 }
  0x7c   :  { %v13_v5 = vpop.permute.xlu0 %12   ;;  %v25_v6 = vpop.permute.xlu1 %24  }
  0x7d   :  { %15 = vst.msk [vmem:[#allocation2] sm:$0x1] %vm14_vm1, %v13_v5  }
  0x80   :  { %v19_v7 = vpop.permute.xlu0 %18  }
  0x81   :  { %21 = vst.msk [vmem:[#allocation2] sm:$0x1] %vm20_vm2, %v19_v7  }
  0x82   :  { %27 = vst.msk [vmem:[#allocation2] sm:$0x1] %vm26_vm3, %v25_v6  }
  0x89   :  { %v31_v8 = vld [vmem:[#allocation2] sm:$0x1] }
  0x8a   :  { %33 = vst [vmem:[#allocation0] sm:$0x1] %v31_v8 }
  0x8b   :  { %59 = shalt.err (!%p56_p4)
}
  0x8c   :  { %s60_s16 = scalar_lea.hbm %s102_s1, 16 }
  0x8d   :  { %p61_p5 = scmp.ne.s32.totalorder %s102_s1, %s60_s16  ;;  %p64_p6 = scmp.lt.u32.totalorder %s60_s16, %s102_s1 }
  0x8f   :  { %p66_p7 = pnand %p64_p6, %p61_p5 }
  0x91   :  { %69 = shalt.err (!%p66_p7)
}
  0x92   :  { %41 = dma.vmem_to_hbm [thread:$0]  %s39_s11, 16, %s102_s1, [#allocation1]  }
  0x93   :  { %70 = dma.done.wait [#allocation1], 16  }
  0x94   :  { %71 = vsyncadd [#allocation1], 4294967280 }
  0x95   :  { %43 = vsyncpa [#allocation1], 1 }

// kernel: _lambda_.2
= control target key start
LH: loop header
LB: loop body
LE: loop exit
PB: predicated region body
PF: predicated region fallthrough
CT: control target
= control target key end

     0   :  { %s1810_s0 = inlined_call_operand.hbm [shape: bf16[2,16,18,96], index: 0, kind: input, shape index: {}]   ;;  %s1811_s1 = inlined_call_operand.hbm [shape: bf16[288,64], index: 1, kind: input, shape index: {}]   ;;  %s1812_s2 = inlined_call_operand.hbm [shape: bf16[2,16,16,64], index: 2, kind: output, shape index: {0}]   ;;  %s1813_s3 = inlined_call_operand.hbm [shape: f32[2,4,2,64], index: 3, kind: output, shape index: {1}]  }
   0x1   :  { %1823 = sst [smem:[#allocation17_spill]] %s1811_s1 }
   0x2   :  { %9 = vsyncpa [#allocation3], 0 }
   0x3   :  { %11 = vsyncpa [#allocation3 + $0x1], 0 }
   0x4   :  { %12 = vsyncpa [#allocation6], 0 }
   0x5   :  { %13 = vsyncpa [#allocation4], 0 }
   0x6   :  { %15 = vsyncpa [#allocation4 + $0x1], 0 }
   0x7   :  { %16 = vsyncpa [#allocation9], 0 }
   0x8   :  { %18 = vsyncpa [#allocation9 + $0x1], 0  ;;  %s1430_s12 = smov 0   ;;  %s1432_s13 = smov 0  }
   0x9   :  { %s1434_s14 = smov 0   ;;  %s1436_s15 = smov 0  }
   0xa   :  { %s1438_s16 = smov 0   ;;  %s1440_s17 = smov 0  }
   0xb   :  { %s1442_s18 = smov 0   ;;  %s1444_s19 = smov 0  }
   0xc LB: > { %1824 = sst [smem:[#allocation14_spill]] %s1391_s17  ;;  %s935_s20 = sadd.s32 4294967295, %s1399_s19   ;;  %s1399_s19 = sphi %s1444_s19, %s24_s19   ;;  %s1395_s18 = sphi %s1442_s18, %s1850_s18   ;;  %s1391_s17 = sphi %s1440_s17, %s1844_s17   ;;  %s1387_s16 = sphi %s1438_s16, %s1849_s16   ;;  %s1383_s15 = sphi %s1436_s15, %s1843_s15   ;;  %s1379_s14 = sphi %s1434_s14, %s1848_s14   ;;  %s1375_s13 = sphi %s1432_s13, %s1847_s13   ;;  %s1371_s12 = sphi %s1430_s12, %s1846_s12  }
   0xd   : > { %s936_s21 = sadd.s32 4294967294, %s1399_s19   ;;  %p58_p0 = scmp.ne.s32.totalorder %s1375_s13, %s1371_s12 }
   0xe   : > { %p1474_p1 = scmp.eq.s32.totalorder %s935_s20, 0  ;;  %p1478_p2 = scmp.eq.s32.totalorder %s935_s20, 7 }
   0xf   : > { %p111_p3 = scmp.eq.s32.totalorder %s936_s21, 7  ;;  %p937_p5 = scmp.ge.s32.totalorder %s1399_s19, 1 }
  0x10   : > { %s1825_s22 = scalar_select %p1474_p1, 1, 0 }
  0x11   : > { %s1826_s23 = scalar_select %p1478_p2, 1, 0 }
  0x12   : > { %p1484_p4 = por %p1474_p1, %p58_p0  ;;  %p1489_p6 = por %p111_p3, %p58_p0 }
  0x13   : > { %p146_p7 = scmp.lt.s32.totalorder %s1399_s19, 9  ;;  %s1401_s27 = smov [#allocation5]  }
  0x14   : > { %s1827_s24 = scalar_select %p1484_p4, 1, 0 }
  0x15   : > { %s1828_s25 = scalar_select %p1489_p6, 1, 0 }
  0x16   : > { %p1494_p8 = pnand %p937_p5, %p146_p7  ;;  %s158_s28 = sshll.u32 %s1401_s27, 4  ;;  %s159_s28 = int_to_ptr.vmem [resolvable:$true] %s158_s28 }
  0x17   : > { %s1831_s1 = sld [smem:[#allocation17_spill]] }
  0x18   : > { %s1829_s26 = scalar_select %p1494_p8, 1, 0 }
  0x19   : > { %p1092_p9 = pneg %p1494_p8 }
  0x1b   : > { %p1502_p10 = pnand %p1092_p9, %p1474_p1 }
  0x1d   : > { %s1207_s5 = scalar_lea.hbm %s1831_s1, 2304  ;;  %p1209_p12 = pneg %p1502_p10 }
  0x1e   : > { %p1208_p11 = scmp.ne.s32.totalorder %s1831_s1, %s1207_s5  ;;  %p1214_p3 = scmp.lt.u32.totalorder %s1207_s5, %s1831_s1 }
  0x20   : > { %p1210_p13 = pnand %p1209_p12, %p1208_p11 }
  0x22   : > { %p1211_p0 = pneg %p1210_p13 }
  0x24   : > { %p1216_p5 = pnand %p1214_p3, %p1211_p0 }
  0x26   : > { %1219 = shalt.err (!%p1216_p5)
}
  0x27   : > { %s1220_s10 = scalar_lea.vmem %s159_s28, 2304  ;;  %p1228_p1 = scmp.lt.s32.totalorder %s159_s28, %s159_s28 }
  0x28   : > { %p1221_p7 = scmp.ne.s32.totalorder %s159_s28, %s1220_s10  ;;  %p1229_p4 = scmp.lt.s32.totalorder %s1220_s10, %s1220_s10 }
  0x2a   : > { %p1223_p9 = pnand %p1221_p7, %p1209_p12  ;;  %p1230_p8 = por %p1229_p4, %p1228_p1 }
  0x2c   : > { %p1224_p6 = pneg %p1223_p9 }
  0x2e   : > { %p1231_p2 = pnand %p1230_p8, %p1224_p6 }
  0x30   : > { %1234 = shalt.err (!%p1231_p2)
}
  0x31   : > { %s1818_s11 = smov 64   ;;  %s1819_s20 = smov 4  }
  0x32   : > { %1095 = dma.hbm_to_vmem [thread:$0]  (!%p1502_p10), %s1831_s1, 2304, %s159_s28, [#allocation6], %s1818_s11, %s1818_s11, %s1819_s20  }
  0x33   : > { %s33_s30 = sadd.s32 1, %s1391_s17  ;;  %s36_s4 = sadd.s32 1, %s1395_s18 }
  0x34   : > { %p34_p1 = scmp.ge.s32.totalorder %s33_s30, 4  ;;  %s45_s5 = sadd.s32 1, %s1379_s14 }
  0x35   : > { %p52_p2 = scmp.ne.s32.totalorder %s1379_s14, %s1375_s13  ;;  %p53_p4 = scmp.eq.s32.totalorder %s1399_s19, 0 }
  0x36   : > { %s1852_s30 = smov (%p34_p1, %s33_s30), 0  ;;  %s1854_s4 = smov (!%p34_p1, %s36_s4), %s1395_s18 }
  0x37   : > { %1832 = sst [smem:[#allocation15_spill]] %s1852_s30  ;;  %s41_s29 = ssub.s32 %s1391_s17, %s1852_s30 }
  0x38   : > { %p38_p6 = scmp.ge.s32.totalorder %s1854_s4, 2  ;;  %p1833_p8 = scmp.ne.s32.totalorder %s1826_s23, 0 }
  0x39   : > { %p54_p10 = por %p53_p4, %p52_p2  ;;  %p1108_p12 = scmp.lt.s32.totalorder %s1399_s19, 8 }
  0x3a   : > { %p1538_p11 = por %p1833_p8, %p52_p2  ;;  %s1856_s4 = smov (%p38_p6, %s1854_s4), 0 }
  0x3b   : > { %1835 = sst [smem:[#allocation16_spill]] %s1856_s4  ;;  %s172_s28 = sand.u32 1, %s1379_s14  }
  0x3c   : > { %s1079_s7 = smul.u32 12, %s1391_s17  ;;  %s40_s8 = ssub.s32 %s1395_s18, %s1856_s4 }
  0x3d   : > { %s42_s9 = sor.u32 %s41_s29, %s40_s8  ;;  %s1078_s10 = smul.u32 48, %s172_s28 }
  0x3e   : > { %p43_p13 = scmp.eq.s32.totalorder %s42_s9, 0  ;;  %s1080_s21 = smul.u32 48, %s1395_s18 }
  0x3f   : > { %p1550_p0 = pnand %p1108_p12, %p54_p10  ;;  %s176_s20 = scalar_lea.vmem [#allocation2], %s1078_s10 }
  0x40   : > { %s1555_s23 = scalar_select %p43_p13, %s1379_s14, %s45_s5  }
  0x41   : > { %s183_s11 = sadd.s32 %s1080_s21, %s1079_s7  ;;  %s186_s1 = sshll.u32 %s176_s20, 4  ;;  %s1557_s1 = int_to_ptr.vmem [resolvable:$true] %s186_s1 }
  0x42   : > { %s942_s30 = sshll.u32 %s183_s11, 6  ;;  %s1564_s8 = scalar_lea.sflag [#allocation3], %s172_s28 }
  0x43   : > { %s1562_s29 = scalar_lea.hbm %s1810_s0, %s942_s30  ;;  %p1237_p5 = pneg %p1550_p0 }
  0x44   : > { %s1235_s9 = scalar_lea.hbm %s1562_s29, 768  ;;  %s1240_s17 = scalar_lea.hbm %s1810_s0, 6144 }
  0x45   : > { %p1236_p3 = scmp.ne.s32.totalorder %s1562_s29, %s1235_s9  ;;  %p1241_p1 = scmp.lt.u32.totalorder %s1562_s29, %s1810_s0 }
  0x46   : > { %p1242_p2 = scmp.lt.u32.totalorder %s1240_s17, %s1235_s9  ;;  %p1244_p6 = scmp.lt.u32.totalorder %s1235_s9, %s1562_s29 }
  0x47   : > { %p1238_p7 = pnand %p1237_p5, %p1236_p3 }
  0x48   : > { %p1243_p4 = por %p1242_p2, %p1241_p1 }
  0x49   : > { %p1239_p9 = pneg %p1238_p7 }
  0x4a   : > { %p1245_p8 = por %p1244_p6, %p1243_p4 }
  0x4c   : > { %p1246_p10 = pnand %p1245_p8, %p1239_p9 }
  0x4e   : > { %1249 = shalt.err (!%p1246_p10)
}
  0x4f   : > { %s1250_s5 = scalar_lea.vmem %s1557_s1, 768  ;;  %s1404_s28 = smov [#allocation2]  }
  0x50   : > { %p1251_p12 = scmp.ne.s32.totalorder %s1557_s1, %s1250_s5  ;;  %s1255_s7 = sshll.u32 %s1404_s28, 4  ;;  %s1256_s7 = int_to_ptr.vmem [resolvable:$false] %s1255_s7 }
  0x51   : > { %s1257_s10 = scalar_lea.vmem %s1256_s7, 1536  ;;  %p1258_p7 = scmp.lt.s32.totalorder %s1557_s1, %s1256_s7 }
  0x52   : > { %p1253_p13 = pnand %p1251_p12, %p1237_p5  ;;  %p1259_p1 = scmp.lt.s32.totalorder %s1257_s10, %s1250_s5 }
  0x54   : > { %p1254_p3 = pneg %p1253_p13  ;;  %p1260_p2 = por %p1259_p1, %p1258_p7 }
  0x56   : > { %p1261_p4 = pnand %p1260_p2, %p1254_p3 }
  0x58   : > { %1264 = shalt.err (!%p1261_p4)
}
  0x59   : > { %s1837_s21 = smov 4   ;;  %s1838_s9 = smov 64  }
  0x5a   : > { %1099 = dma.hbm_to_vmem [thread:$0]  (!%p1550_p0), %s1562_s29, 768, %s1557_s1, %s1564_s8, %s1838_s9, %s1838_s9, %s1837_s21  }
  0x5b   : > { %p1839_p5 = scmp.ne.s32.totalorder %s1829_s26, 0 }
  0x5c   : > { %s1598_s11 = sand.u32 (!%p1839_p5), 1, %s1375_s13   ;;  %p1840_p9 = scmp.ne.s32.totalorder (!%p1839_p5), %s1827_s24, 0 }
  0x5d   : > { %198 = sbr.rel (%p1839_p5) target bundleno = 516 (0x204), region = 28  ;;  %s201_s17 = scalar_lea.sflag (!%p1839_p5), [#allocation3], %s1598_s11 }
  0x5e   : > { %s1081_s20 = smul.u32 (!%p1839_p5), 48, %s1598_s11 }
  0x60   : > { %s1602_s30 = scalar_lea.vmem (!%p1839_p5), [#allocation2], %s1081_s20 }
  0x64   : > { %1354 = dma.done.wait (%p1840_p9), %s201_s17, 768  }
  0x65   : > { %1356 = vsyncadd (%p1840_p9), %s201_s17, 4294966528  ;;  %p1841_p0 = scmp.ne.s32.totalorder %s1825_s22, 0 }
  0x67   : > { %1358 = dma.done.wait (%p1841_p0), [#allocation6], 2304  }
  0x68   : > { %1360 = vsyncadd (%p1841_p0), [#allocation6], 4294964992  ;;  %vm283_vm0 = vsmask.f32 7424  ;;  %v1613_v0 = vld [vmem:[%s1602_s30 + $0x24] sm:$0xff]   ;;  %vm340_vm1 = vcmask 1046528  }
  0x69   : > { %v1182_v1 = vld [vmem:[%s1602_s30 + $0x2c] ss:$0 sps:$4 sm:$0x11]   ;;  %v1617_v2 = vld [vmem:[%s1602_s30] sm:$0xff]   ;;  %v321_v3 = vshrl.u32 %v1613_v0, 16  ;;  %v323_v4 = vshll.u32 %v1613_v0, 16 }
  0x6a   : > { %v328_v5 = vshll.u32 %v1182_v1, 16  ;;  %v1184_v6 = vld [vmem:[%s1602_s30 + $0x8] ss:$0 sps:$4 sm:$0x11]   ;;  %v285_v7 = vshrl.u32 %v1617_v2, 16  ;;  %v287_v8 = vshll.u32 %v1617_v2, 16 }
  0x6b   : > { %v325_v9 = vrot.slane %v323_v4, 1  ;;  %v292_v11 = vshll.u32 %v1184_v6, 16  ;;  %v350_v12 = vrot.slane %v1613_v0, 1  ;;  %v351_v14 = vrot.slane %v1182_v1, 1  ;;  %v1626_v15 = vld [vmem:[%s1602_s30 + $0xc] sm:$0xff]   ;;  %v1629_v16 = vld [vmem:[%s1602_s30 + $0x18] sm:$0xff]  }
  0x6c   : > { %v330_v10 = vrot.slane %v328_v5, 1  ;;  %v289_v13 = vrot.slane %v287_v8, 1  ;;  %v1186_v19 = vld [vmem:[%s1602_s30 + $0x14] ss:$0 sps:$4 sm:$0x11]   ;;  %v341_v21 = vrot.slane %v1617_v2, 1 }
  0x6d   : > { %v326_v17 = vor.u32 %v325_v9, %v321_v3  ;;  %v294_v18 = vrot.slane %v292_v11, 1  ;;  %v342_v22 = vrot.slane %v1184_v6, 1  ;;  %v297_v24 = vshrl.u32 %v1626_v15, 16  ;;  %v1188_v27 = vld [vmem:[%s1602_s30 + $0x20] ss:$0 sps:$4 sm:$0x11]  }
  0x6e   : > { %v290_v20 = vor.u32 %v289_v13, %v285_v7  ;;  %v299_v25 = vshll.u32 %v1626_v15, 16  ;;  %v304_v26 = vshll.u32 %v1186_v19, 16  ;;  %s1405_s1 = smov 96   ;;  %v344_v29 = vrot.slane %v1626_v15, 1  ;;  %v1189_v32 = vld [vmem:[#allocation5 + $0x40] sm:$0xff]   ;;  %v1191_v42 = vld [vmem:[#allocation5 + $0x48] sm:$0xff]  }
  0x6f   : > { %v331_v23 = vsel %vm283_vm0, %v326_v17, %v330_v10  ;;  %v345_v30 = vrot.slane %v1186_v19, 1  ;;  %v311_v31 = vshll.u32 %v1629_v16, 16  ;;  %v352_v33 = vsel %vm340_vm1, %v350_v12, %v351_v14  ;;  %v1190_v37 = vld [vmem:[#allocation5] sm:$0xff]   ;;  %1004 = vmatprep.subr.bf16.mxu0 %v1189_v32  ;;  %1062 = vmatprep.subr.bf16.mxu1 %v1189_v32  ;;  %s1406_s22 = smov 64   ;;  %v1192_v44 = vld [vmem:[#allocation5 + $0x8] sm:$0xff]   ;;  %v1193_v47 = vld [vmem:[#allocation5 + $0x50] sm:$0xff]  }
  0x70   : > { %338 = vrot.lane.b32.xlu1 %v331_v23, %s1405_s1  ;;  %v295_v28 = vsel %vm283_vm0, %v290_v20, %v294_v18  ;;  %v301_v34 = vrot.slane %v299_v25, 1  ;;  %v306_v35 = vrot.slane %v304_v26, 1  ;;  %v309_v36 = vshrl.u32 %v1629_v16, 16  ;;  %1005 = vmatpush3.bf16.msra.mxu0 %v1190_v37  ;;  %v1194_v51 = vld [vmem:[#allocation5 + $0x10] sm:$0xff]   ;;  %v1195_v52 = vld [vmem:[#allocation5 + $0x58] sm:$0xff]   ;;  %v1197_v56 = vld [vmem:[#allocation5 + $0x60] sm:$0xff]  }
  0x71   : > { %332 = vrot.lane.b32.xlu0 %v295_v28, %s1405_s1  ;;  %v343_v38 = vsel %vm340_vm1, %v341_v21, %v342_v22  ;;  %v313_v39 = vrot.slane %v311_v31, 1  ;;  %v316_v40 = vshll.u32 %v1188_v27, 16  ;;  %1070 = vmatpush3.bf16.msra.mxu1 %v1190_v37  ;;  %v347_v43 = vrot.slane %v1629_v16, 1  ;;  %v1196_v55 = vld [vmem:[#allocation5 + $0x18] sm:$0xff]   ;;  %v1198_v57 = vld [vmem:[#allocation5 + $0x20] sm:$0xff]   ;;  %v1199_v58 = vld [vmem:[#allocation5 + $0x68] sm:$0xff]  }
  0x72   : > { %v302_v41 = vor.u32 %v301_v34, %v297_v24  ;;  %v346_v45 = vsel %vm340_vm1, %v344_v29, %v345_v30  ;;  %v348_v46 = vrot.slane %v1188_v27, 1  ;;  %1006 = vmatprep.subr.bf16.mxu0 %v1191_v42  ;;  %1063 = vmatprep.subr.bf16.mxu1 %v1191_v42  ;;  %v1200_v59 = vld [vmem:[#allocation5 + $0x28] sm:$0xff]   ;;  %v1201_v60 = vld [vmem:[#allocation5 + $0x70] sm:$0xff]   ;;  %v1203_v62 = vld [vmem:[#allocation5 + $0x78] sm:$0xff]   ;;  %vm374_vm2 = vcmask 523264   ;;  %s945_s24 = sshll.u32 %s1598_s11, 5 }
  0x73   : > { %v314_v49 = vor.u32 %v313_v39, %v309_v36  ;;  %v318_v50 = vrot.slane %v316_v40, 1  ;;  %v1202_v61 = vld [vmem:[#allocation5 + $0x30] sm:$0xff]   ;;  %v1204_v63 = vld [vmem:[#allocation5 + $0x38] sm:$0xff]   ;;  %v1205_v1 = vld [vmem:[#allocation5 + $0x80] sm:$0xff]   ;;  %vm361_vm3 = vcmask 785408   ;;  %vm531_vm4 = vcmask 261120  }
  0x74   : > { %359 = vrot.lane.b32.xlu1 %v352_v33, %s1406_s22  ;;  %v307_v48 = vsel %vm283_vm0, %v302_v41, %v306_v35  ;;  %1007 = vmatpush3.bf16.msra.mxu0 %v1192_v44  ;;  %v349_v53 = vsel %vm340_vm1, %v347_v43, %v348_v46  ;;  %v1206_v8 = vld [vmem:[#allocation5 + $0x88] sm:$0xff]   ;;  %vm755_vm5 = vcmask 519168   ;;  %s1673_s26 = scalar_lea.vmem [#allocation7], %s945_s24  ;;  %s1003_s27 = sshll.u32 %s1383_s15, 3 }
  0x75   : > { %353 = vrot.lane.b32.xlu0 %v343_v38, %s1406_s22  ;;  %1071 = vmatpush3.bf16.msra.mxu1 %v1192_v44  ;;  %v319_v54 = vsel %vm283_vm0, %v314_v49, %v318_v50  ;;  %s989_s29 = sshll.u32 %s1387_s16, 5  ;;  %s786_s4 = sshll.u32 %s1673_s26, 4  ;;  %s1706_s4 = int_to_ptr.vmem [resolvable:$true] %s786_s4 }
  0x76   : > { %1008 = vmatprep.subr.bf16.mxu0 %v1193_v47  ;;  %1064 = vmatprep.subr.bf16.mxu1 %v1193_v47  ;;  %s783_s8 = sadd.s32 %s1003_s27, %s989_s29  ;;  %s765_s21 = scalar_lea.sflag [#allocation4], %s1598_s11 }
  0x77   : > { %s990_s5 = sshll.u32 %s783_s8, 6  ;;  %s1265_s9 = scalar_lea.vmem %s1706_s4, 512 }
  0x78   : > { %355 = vrot.lane.b32.xlu1 %v346_v45, %s1406_s22  ;;  %1009 = vmatpush3.bf16.msra.mxu0 %v1194_v51  ;;  %s1712_s10 = scalar_lea.hbm %s1812_s2, %s990_s5  ;;  %p1266_p6 = scmp.ne.s32.totalorder %s1706_s4, %s1265_s9 }
  0x79   : > { %334 = vrot.lane.b32.xlu0 %v307_v48, %s1405_s1  ;;  %1072 = vmatpush3.bf16.msra.mxu1 %v1194_v51  ;;  %s1407_s20 = smov [#allocation7]  }
  0x7a   : > { %1010 = vmatprep.subr.bf16.mxu0 %v1195_v52  ;;  %1065 = vmatprep.subr.bf16.mxu1 %v1195_v52  ;;  %p1267_p8 = pnand %p1266_p6, %p1538_p11  ;;  %s1269_s17 = sshll.u32 %s1407_s20, 4  ;;  %s1270_s17 = int_to_ptr.vmem [resolvable:$false] %s1269_s17 }
  0x7b   : > { %s1271_s30 = scalar_lea.vmem %s1270_s17, 1024  ;;  %p1272_p12 = scmp.lt.s32.totalorder %s1706_s4, %s1270_s17 }
  0x7c   : > { %357 = vrot.lane.b32.xlu1 %v349_v53, %s1406_s22  ;;  %1011 = vmatpush3.bf16.msra.mxu0 %v1196_v55  ;;  %p1268_p10 = pneg %p1267_p8  ;;  %p1273_p13 = scmp.lt.s32.totalorder %s1271_s30, %s1265_s9 }
  0x7d   : > { %336 = vrot.lane.b32.xlu0 %v319_v54, %s1405_s1  ;;  %1073 = vmatpush3.bf16.msra.mxu1 %v1196_v55 }
  0x7e   : > { %1012 = vmatprep.subr.bf16.mxu0 %v1197_v56  ;;  %1066 = vmatprep.subr.bf16.mxu1 %v1197_v56  ;;  %p1274_p3 = por %p1273_p13, %p1272_p12 }
  0x80   : > { %1013 = vmatpush3.bf16.msra.mxu0 %v1198_v57  ;;  %p1275_p7 = pnand %p1274_p3, %p1268_p10 }
  0x81   : > { %1074 = vmatpush3.bf16.msra.mxu1 %v1198_v57  ;;  %1014 = vmatprep.subr.bf16.mxu0 %v1199_v58 }
  0x82   : > { %1067 = vmatprep.subr.bf16.mxu1 %v1199_v58 }
  0x84   : > { %1015 = vmatpush3.bf16.msra.mxu0 %v1200_v59 }
  0x85   : > { %1075 = vmatpush3.bf16.msra.mxu1 %v1200_v59  ;;  %1016 = vmatprep.subr.bf16.mxu0 %v1201_v60 }
  0x86   : > { %1068 = vmatprep.subr.bf16.mxu1 %v1201_v60 }
  0x88   : > { %1017 = vmatpush3.bf16.msra.mxu0 %v1202_v61 }
  0x89   : > { %1076 = vmatpush3.bf16.msra.mxu1 %v1202_v61  ;;  %1018 = vmatprep.subr.bf16.mxu0 %v1203_v62 }
  0x8a   : > { %1069 = vmatprep.subr.bf16.mxu1 %v1203_v62 }
  0x8c   : > { %1019 = vmatpush3.bf16.msra.mxu0 %v1204_v63 }
  0x8d   : > { %1077 = vmatpush3.bf16.msra.mxu1 %v1204_v63 }
  0x8e   : > { %1050 = vmatprep.subr.bf16.mxu1 %v1205_v1 }
  0xe2   : > { %v339_v3 = vpop.permute.xlu1 %338 }
  0xe3   : > { %v333_v4 = vpop.permute.xlu0 %332  ;;  %v372_v10 = vsel %vm361_vm3, %v1613_v0, %v339_v3 }
  0xe4   : > { %v363_v11 = vsel %vm361_vm3, %v1617_v2, %v333_v4 }
  0xe6   : > { %v360_v5 = vpop.permute.xlu1 %359 }
  0xe7   : > { %v354_v6 = vpop.permute.xlu0 %353  ;;  %v385_v7 = vsel %vm374_vm2, %v339_v3, %v360_v5 }
  0xe8   : > { %v376_v9 = vsel %vm374_vm2, %v333_v4, %v354_v6  ;;  %596 = vmatprep.mubr.bf16.mxu1 %v385_v7 }
  0xe9   : > { %572 = vmatprep.mubr.bf16.mxu0 %v376_v9  ;;  %597 = vmatmul.mubr.bf16.vlgmr.msra.gmra.mrb[0].mxu1 %v372_v10 }
  0xea   : > { %573 = vmatmul.mubr.bf16.vlgmr.msra.gmra.mrb[0].mxu0 %v363_v11  ;;  %1051 = vmatpush3.bf16.msra.mxu1 %v1205_v1  ;;  %v356_v12 = vpop.permute.xlu1 %355 }
  0xeb   : > { %1054 = vmatprep.mubr.msk.bf16.mxu1 %vm531_vm4, %v354_v6  ;;  %1052 = vmatprep.subr.bf16.mxu1 %v1206_v8  ;;  %v335_v13 = vpop.permute.xlu0 %334 }
  0xec   : > { %v379_v14 = vsel %vm374_vm2, %v335_v13, %v356_v12  ;;  %v366_v0 = vsel %vm361_vm3, %v1626_v15, %v335_v13 }
  0xed   : > { %580 = vmatprep.mubr.bf16.mxu0 %v379_v14 }
  0xee   : > { %1053 = vmatpush3.bf16.msra.mxu1 %v1206_v8  ;;  %v358_v17 = vpop.permute.xlu1 %357 }
  0xef   : > { %v337_v18 = vpop.permute.xlu0 %336 }
  0xf0   : > { %v382_v19 = vsel %vm374_vm2, %v337_v18, %v358_v17  ;;  %v369_v2 = vsel %vm361_vm3, %v1629_v16, %v337_v18 }
  0xf1   : > { %1055 = vmatmul.mubr.msk.bf16.vlgmr.msra.gmra.mrb[4].mxu1 %vm531_vm4, %v356_v12 }
  0xf2   : > { %581 = vmatmul.mubr.bf16.gmra.mrb[4].mxu0 %v366_v0  ;;  %1058 = vmatprep.mubr.msk.bf16.mxu1 %vm531_vm4, %v358_v17 }
  0xf3   : > { %588 = vmatprep.mubr.bf16.mxu0 %v382_v19 }
  0xf9   : > { %1059 = vmatmul.mubr.msk.bf16.gmra.mrb[8].mxu1 %vm531_vm4, %v360_v5 }
  0xfa   : > { %589 = vmatmul.mubr.bf16.gmra.mrb[8].mxu0 %v369_v2 }
 0x1bc   : > { %v1038_v20 = vpop.f32.mrb[0].mxu1 }
 0x1bd   : > { %v1020_v21 = vpop.f32.mrb[0].mxu0  ;;  %v1039_v22 = vpop.f32.mrb[1].mxu1 }
 0x1be   : > { %v1021_v15 = vpop.f32.mrb[1].mxu0  ;;  %v1040_v23 = vadd.f32 %v1039_v22, %v1038_v20  ;;  %v1041_v24 = vpop.f32.mrb[2].mxu1 }
 0x1bf   : > { %v1022_v25 = vadd.f32 %v1021_v15, %v1020_v21  ;;  %v1023_v26 = vpop.f32.mrb[2].mxu0  ;;  %v1042_v27 = vpop.f32.mrb[3].mxu1 }
 0x1c0   : > { %v1024_v28 = vpop.f32.mrb[3].mxu0  ;;  %v1043_v29 = vadd.f32 %v1042_v27, %v1041_v24 }
 0x1c1   : > { %v1025_v30 = vadd.f32 %v1024_v28, %v1023_v26 }
 0x1c4   : > { %v1056_v31 = vpop.f32.mrb[4].mxu1 }
 0x1c5   : > { %v1026_v32 = vpop.f32.mrb[4].mxu0  ;;  %v639_v16 = vpop.f32.mrb[5].mxu1 }
 0x1c6   : > { %v1027_v33 = vpop.f32.mrb[5].mxu0  ;;  %v640_v34 = vadd.f32 %v1022_v25, %v639_v16  ;;  %v1057_v35 = vpop.f32.mrb[6].mxu1 }
 0x1c7   : > { %v1028_v36 = vadd.f32 %v1027_v33, %v1026_v32  ;;  %v1029_v37 = vpop.f32.mrb[6].mxu0  ;;  %v642_v38 = vpop.f32.mrb[7].mxu1 }
 0x1c8   : > { %v995_v39 = vpack.c.bf16 %v640_v34, %v640_v34  ;;  %v1030_v40 = vpop.f32.mrb[7].mxu0  ;;  %v643_v41 = vadd.f32 %v1025_v30, %v642_v38  ;;  %v693_v43 = vmul.f32 %v640_v34, %v640_v34  ;;  %v670_v50 = vsel %vm374_vm2, %v640_v34, 0.0 }
 0x1c9   : > { %v648_v42 = vadd.f32 %v1056_v31, %v1028_v36  ;;  %v1031_v44 = vadd.f32 %v1030_v40, %v1029_v37 }
 0x1ca   : > { %756 = vst.msk [vmem:[%s1673_s26] sm:$0xf] %vm755_vm5, %v995_v39  ;;  %v671_v45 = vsel %vm374_vm2, %v643_v41, 0.0  ;;  %v694_v46 = vmul.f32 %v643_v41, %v643_v41  ;;  %v996_v47 = vpack.c.bf16 %v643_v41, %v643_v41  ;;  %v701_v56 = vsel %vm374_vm2, %v693_v43, 0.0 }
 0x1cb   : > { %v695_v48 = vmul.f32 %v648_v42, %v648_v42  ;;  %v997_v49 = vpack.c.bf16 %v648_v42, %v648_v42  ;;  %v651_v51 = vadd.f32 %v1057_v35, %v1031_v44  ;;  %v672_v52 = vadd.f32 %v671_v45, %v670_v50 }
 0x1cc   : > { %v702_v53 = vsel %vm374_vm2, %v694_v46, 0.0  ;;  %757 = vst.msk [vmem:[%s1673_s26 + $0x4] sm:$0xf] %vm755_vm5, %v996_v47  ;;  %v1060_v54 = vpop.f32.mrb[8].mxu1  ;;  %v673_v55 = vsel %vm374_vm2, %v648_v42, 0.0 }
 0x1cd   : > { %758 = vst.msk [vmem:[%s1673_s26 + $0x8] sm:$0xf] %vm755_vm5, %v997_v49  ;;  %v696_v57 = vmul.f32 %v651_v51, %v651_v51  ;;  %v998_v58 = vpack.c.bf16 %v651_v51, %v651_v51  ;;  %v1032_v59 = vpop.f32.mrb[8].mxu0  ;;  %v655_v60 = vpop.f32.mrb[9].mxu1  ;;  %v674_v61 = vadd.f32 %v673_v55, %v672_v52  ;;  %v703_v62 = vadd.f32 %v702_v53, %v701_v56 }
 0x1ce   : > { %v664_v63 = vadd.f32 %v1060_v54, %v1040_v23  ;;  %v1033_v1 = vpop.f32.mrb[9].mxu0  ;;  %v1061_v3 = vpop.f32.mrb[10].mxu1  ;;  %v704_v4 = vsel %vm374_vm2, %v695_v48, 0.0  ;;  %v675_v9 = vsel %vm374_vm2, %v651_v51, 0.0 }
 0x1cf   : > { %759 = vst.msk [vmem:[%s1673_s26 + $0xc] sm:$0xf] %vm755_vm5, %v998_v58  ;;  %v1034_v5 = vadd.f32 %v1033_v1, %v1032_v59  ;;  %v1035_v6 = vpop.f32.mrb[10].mxu0  ;;  %v1691_v7 = vadd.f32 %v1061_v3, %v1043_v29  ;;  %v658_v8 = vpop.f32.mrb[11].mxu1  ;;  %v705_v10 = vadd.f32 %v704_v4, %v703_v62  ;;  %v706_v13 = vsel %vm374_vm2, %v696_v57, 0.0 }
 0x1d0   : > { %v1001_v11 = vpack.c.bf16 %v664_v63, %v664_v63  ;;  %v1036_v12 = vpop.f32.mrb[11].mxu0  ;;  %v676_v17 = vadd.f32 %v675_v9, %v674_v61  ;;  %v699_v23 = vmul.f32 %v664_v63, %v664_v63  ;;  %v681_v30 = vsel %vm374_vm2, %v664_v63, 0.0 }
 0x1d1   : > { %v656_v14 = vadd.f32 %v1034_v5, %v655_v60  ;;  %v707_v0 = vadd.f32 %v706_v13, %v705_v10  ;;  %v1002_v18 = vpack.c.bf16 %v1691_v7, %v1691_v7  ;;  %v1037_v19 = vadd.f32 %v1036_v12, %v1035_v6 }
 0x1d2   : > { %762 = vst.msk [vmem:[%s1673_s26 + $0x18] sm:$0xf] %vm755_vm5, %v1001_v11  ;;  %v700_v31 = vmul.f32 %v1691_v7, %v1691_v7 }
 0x1d3   : > { %v677_v2 = vsel %vm374_vm2, %v656_v14, 0.0  ;;  %v697_v20 = vmul.f32 %v656_v14, %v656_v14  ;;  %v999_v21 = vpack.c.bf16 %v656_v14, %v656_v14  ;;  %763 = vst.msk [vmem:[%s1673_s26 + $0x1c] sm:$0xf] %vm755_vm5, %v1002_v18  ;;  %v659_v15 = vadd.f32 %v1037_v19, %v658_v8 }
 0x1d4   : > { %v678_v22 = vadd.f32 %v677_v2, %v676_v17 }
 0x1d5   : > { %v708_v24 = vsel %vm374_vm2, %v697_v20, 0.0  ;;  %760 = vst.msk [vmem:[%s1673_s26 + $0x10] sm:$0xf] %vm755_vm5, %v999_v21  ;;  %v679_v26 = vsel %vm374_vm2, %v659_v15, 0.0  ;;  %v698_v27 = vmul.f32 %v659_v15, %v659_v15  ;;  %v1000_v28 = vpack.c.bf16 %v659_v15, %v659_v15 }
 0x1d6   : > { %v709_v25 = vadd.f32 %v708_v24, %v707_v0  ;;  %v680_v29 = vadd.f32 %v679_v26, %v678_v22 }
 0x1d7   : > { %v710_v32 = vsel %vm374_vm2, %v698_v27, 0.0  ;;  %761 = vst.msk [vmem:[%s1673_s26 + $0x14] sm:$0xf] %vm755_vm5, %v1000_v28 }
 0x1d8   : > { %v682_v16 = vadd.f32 %v681_v30, %v680_v29  ;;  %v711_v33 = vadd.f32 %v710_v32, %v709_v25 }
 0x1d9   : > { %1278 = shalt.err (!%p1275_p7)
}
 0x1da   : > { %s1279_s1 = scalar_lea.hbm %s1712_s10, 512  ;;  %s1283_s27 = scalar_lea.hbm %s1812_s2, 4096 }
 0x1db   : > { %p1280_p1 = scmp.ne.s32.totalorder %s1712_s10, %s1279_s1  ;;  %p1284_p5 = scmp.lt.u32.totalorder %s1712_s10, %s1812_s2 }
 0x1dc   : > { %p1285_p9 = scmp.lt.u32.totalorder %s1283_s27, %s1279_s1  ;;  %p1287_p6 = scmp.lt.u32.totalorder %s1279_s1, %s1712_s10 }
 0x1dd   : > { %p1281_p2 = pnand %p1280_p1, %p1538_p11 }
 0x1de   : > { %p1286_p0 = por %p1285_p9, %p1284_p5 }
 0x1df   : > { %p1282_p4 = pneg %p1281_p2 }
 0x1e0   : > { %p1288_p8 = por %p1287_p6, %p1286_p0 }
 0x1e2   : > { %p1289_p10 = pnand %p1288_p8, %p1282_p4 }
 0x1e4   : > { %1292 = shalt.err (!%p1289_p10)
}
 0x1e5   : > { %s1408_s5 = smov 4   ;;  %v712_v34 = vsel %vm374_vm2, %v699_v23, 0.0  ;;  %v683_v35 = vsel %vm374_vm2, %v1691_v7, 0.0  ;;  %v714_v38 = vsel %vm374_vm2, %v700_v31, 0.0  ;;  %s946_s28 = sshll.u32 %s1598_s11, 1  ;;  %vm691_vm6 = vcmask 516096  }
 0x1e6   : > { %1088 = dma.vmem_to_hbm [thread:$0]  (%p1538_p11), %s1706_s4, 512, %s1712_s10, %s765_s21, %s1406_s22, %s1406_s22, %s1408_s5   ;;  %v684_v36 = vadd.f32 %v683_v35, %v682_v16  ;;  %v713_v37 = vadd.f32 %v712_v34, %v711_v33 }
 0x1e7   : > { %s991_s7 = sshll.u32 %s1387_s16, 2  ;;  %s235_s10 = scalar_lea.vmem [#allocation8], %s946_s28 }
 0x1e8   : > { %v685_v39 = vrot.slane %v684_v36, 4  ;;  %v715_v40 = vadd.f32 %v714_v38, %v713_v37  ;;  %s800_s22 = sadd.s32 %s1383_s15, %s991_s7  ;;  %s804_s21 = sshll.u32 %s235_s10, 4  ;;  %s1758_s21 = int_to_ptr.vmem [resolvable:$true] %s804_s21 }
 0x1e9   : > { %s992_s4 = sshll.u32 %s800_s22, 5  ;;  %s770_s15 = scalar_lea.sflag [#allocation9], %s1598_s11 }
 0x1ea   : > { %v686_v41 = vadd.f32 %v685_v39, %v684_v36  ;;  %v716_v42 = vrot.slane %v715_v40, 4  ;;  %s1756_s16 = scalar_lea.hbm %s1813_s3, %s992_s4  ;;  %s1293_s17 = scalar_lea.vmem %s1758_s21, 32 }
 0x1eb   : > { %p1294_p12 = scmp.ne.s32.totalorder %s1758_s21, %s1293_s17  ;;  %s1409_s30 = smov [#allocation8]  }
 0x1ec   : > { %v687_v43 = vrot.slane %v686_v41, 2  ;;  %v717_v44 = vadd.f32 %v716_v42, %v715_v40  ;;  %s1297_s1 = sshll.u32 %s1409_s30, 4  ;;  %s1298_s1 = int_to_ptr.vmem [resolvable:$false] %s1297_s1 }
 0x1ed   : > { %p1295_p13 = pnand %p1294_p12, %p1538_p11  ;;  %s1299_s24 = scalar_lea.vmem %s1298_s1, 64 }
 0x1ee   : > { %v688_v45 = vadd.f32 %v687_v43, %v686_v41  ;;  %v718_v46 = vrot.slane %v717_v44, 2  ;;  %p1300_p7 = scmp.lt.s32.totalorder %s1758_s21, %s1298_s1  ;;  %p1301_p1 = scmp.lt.s32.totalorder %s1299_s24, %s1293_s17 }
 0x1ef   : > { %p1296_p3 = pneg %p1295_p13 }
 0x1f0   : > { %v689_v47 = vrot.slane %v688_v45, 1  ;;  %v719_v48 = vadd.f32 %v718_v46, %v717_v44  ;;  %p1302_p2 = por %p1301_p1, %p1300_p7 }
 0x1f2   : > { %v690_v49 = vadd.f32 %v689_v47, %v688_v45  ;;  %v720_v50 = vrot.slane %v719_v48, 1  ;;  %p1303_p4 = pnand %p1302_p2, %p1296_p3 }
 0x1f4   : > { %692 = vst.msk [vmem:[%s235_s10] sm:$0x1] %vm691_vm6, %v690_v49  ;;  %v721_v51 = vadd.f32 %v720_v50, %v719_v48 }
 0x1f6   : > { %722 = vst.msk [vmem:[%s235_s10 + $0x1] sm:$0x1] %vm691_vm6, %v721_v51 }
 0x1f7   : > { %1306 = shalt.err (!%p1303_p4)
}
 0x1f8   : > { %s1307_s11 = scalar_lea.hbm %s1756_s16, 32  ;;  %s1311_s29 = scalar_lea.hbm %s1813_s3, 256 }
 0x1f9   : > { %p1308_p5 = scmp.ne.s32.totalorder %s1756_s16, %s1307_s11  ;;  %p1312_p6 = scmp.lt.u32.totalorder %s1756_s16, %s1813_s3 }
 0x1fa   : > { %p1313_p8 = scmp.lt.u32.totalorder %s1311_s29, %s1307_s11  ;;  %p1315_p12 = scmp.lt.u32.totalorder %s1307_s11, %s1756_s16 }
 0x1fb   : > { %p1309_p9 = pnand %p1308_p5, %p1538_p11 }
 0x1fc   : > { %p1314_p10 = por %p1313_p8, %p1312_p6 }
 0x1fd   : > { %p1310_p0 = pneg %p1309_p9 }
 0x1fe   : > { %p1316_p13 = por %p1315_p12, %p1314_p10 }
 0x200   : > { %p1317_p3 = pnand %p1316_p13, %p1310_p0 }
 0x202   : > { %1320 = shalt.err (!%p1317_p3)
}
 0x203   : > { %1089 = dma.vmem_to_hbm [thread:$0]  (%p1538_p11), %s1758_s21, 32, %s1756_s16, %s770_s15  }
 0x204 PF: > { %p1110_p7 = scmp.ge.s32.totalorder %s1399_s19, 2  ;;  %s816_s28 = sand.u32 1, %s1371_s12  }
 0x205   : > { %p1842_p1 = scmp.ne.s32.totalorder %s1828_s25, 0  ;;  %s817_s7 = scalar_lea.sflag [#allocation4], %s816_s28 }
 0x207   : > { %p1101_p2 = pnand %p1110_p7, %p1842_p1 }
 0x209   : > { %1362 = dma.done.wait (!%p1101_p2), %s817_s7, 512  }
 0x20a   : > { %1364 = vsyncadd (!%p1101_p2), %s817_s7, 4294966784  ;;  %s826_s22 = scalar_lea.sflag [#allocation9], %s816_s28 }
 0x20b   : > { %1366 = dma.done.wait (!%p1101_p2), %s826_s22, 32  }
 0x20c   : > { %1368 = vsyncadd (!%p1101_p2), %s826_s22, 4294967264  ;;  %s24_s19 = sadd.s32 1, %s1399_s19   ;;  %s1843_s15 = sld [smem:[#allocation14_spill]] }
 0x20d   : > { %p21_p4 = scmp.ge.s32.totalorder %s24_s19, 10   ;;  %s1844_s17 = sld [smem:[#allocation15_spill]] }
 0x20e   : > { %s1845_s6 = sld [smem:[#allocation16_spill]]  ;;  %s1846_s12 = smov %s1375_s13 }
 0x20f   : > { %s1847_s13 = smov %s1379_s14  ;;  %s1848_s14 = smov %s1555_s23 }
 0x210   : > { %s1849_s16 = smov %s1395_s18  ;;  %23 = sbr.rel (!%p21_p4) target bundleno = 12 (0xc), region = 94 }
 0x214   : > { %s1850_s18 = smov %s1845_s6 }
 0x217   :  { %831 = vsyncpa [#allocation3], 1 }
 0x218   :  { %833 = vsyncpa [#allocation3 + $0x1], 1 }
 0x219   :  { %834 = vsyncpa [#allocation6], 1 }
 0x21a   :  { %835 = vsyncpa [#allocation4], 1 }
 0x21b   :  { %837 = vsyncpa [#allocation4 + $0x1], 1 }
 0x21c   :  { %838 = vsyncpa [#allocation9], 1 }
 0x21d   :  { %840 = vsyncpa [#allocation9 + $0x1], 1 }

// kernel: _lambda_.3
= control target key start
LH: loop header
LB: loop body
LE: loop exit
PB: predicated region body
PF: predicated region fallthrough
CT: control target
= control target key end

     0   :  { %s1089_s0 = inlined_call_operand.hbm [shape: bf16[2,16,16,64], index: 0, kind: input, shape index: {}]   ;;  %s1090_s1 = inlined_call_operand.hbm [shape: f32[1,64], index: 1, kind: input, shape index: {}]   ;;  %s1091_s2 = inlined_call_operand.hbm [shape: f32[1,64], index: 2, kind: input, shape index: {}]   ;;  %s1092_s3 = inlined_call_operand.hbm [shape: f32[2,16,16,64], index: 3, kind: output, shape index: {}]  }
   0x1   :  { %1101 = sst [smem:[#allocation14_spill]] %s1090_s1 }
   0x2   :  { %1102 = sst [smem:[#allocation15_spill]] %s1091_s2 }
   0x3   :  { %8 = vsyncpa [#allocation3], 0 }
   0x4   :  { %10 = vsyncpa [#allocation3 + $0x1], 0 }
   0x5   :  { %11 = vsyncpa [#allocation6], 0 }
   0x6   :  { %12 = vsyncpa [#allocation4], 0 }
   0x7   :  { %14 = vsyncpa [#allocation4 + $0x1], 0  ;;  %s807_s12 = smov 0   ;;  %s809_s13 = smov 0  }
   0x8   :  { %s811_s14 = smov 0   ;;  %s813_s15 = smov 0  }
   0x9   :  { %s815_s16 = smov 0   ;;  %s817_s17 = smov 0  }
   0xa   :  { %s819_s18 = smov 0   ;;  %s821_s19 = smov 0  }
   0xb LB: > { %1103 = sst [smem:[#allocation12_spill]] %s769_s17  ;;  %s440_s20 = sadd.s32 4294967295, %s777_s19   ;;  %s777_s19 = sphi %s821_s19, %s20_s19   ;;  %s773_s18 = sphi %s819_s18, %s1128_s18   ;;  %s769_s17 = sphi %s817_s17, %s1123_s17   ;;  %s765_s16 = sphi %s815_s16, %s1127_s16   ;;  %s761_s15 = sphi %s813_s15, %s1122_s15   ;;  %s757_s14 = sphi %s811_s14, %s1126_s14   ;;  %s753_s13 = sphi %s809_s13, %s1125_s13   ;;  %s749_s12 = sphi %s807_s12, %s1124_s12  }
   0xc   : > { %s441_s21 = sadd.s32 4294967294, %s777_s19   ;;  %p48_p0 = scmp.ne.s32.totalorder %s757_s14, %s753_s13 }
   0xd   : > { %p49_p1 = scmp.eq.s32.totalorder %s777_s19, 0  ;;  %p54_p2 = scmp.ne.s32.totalorder %s753_s13, %s749_s12 }
   0xe   : > { %p855_p3 = scmp.eq.s32.totalorder %s440_s20, 0  ;;  %p122_p4 = scmp.eq.s32.totalorder %s440_s20, 7 }
   0xf   : > { %p859_p5 = por %p49_p1, %p48_p0  ;;  %p128_p6 = scmp.eq.s32.totalorder %s441_s21, 7 }
  0x10   : > { %s1104_s23 = scalar_select %p855_p3, 1, 0 }
  0x11   : > { %p865_p7 = por %p855_p3, %p54_p2  ;;  %p869_p8 = por %p122_p4, %p48_p0 }
  0x12   : > { %p873_p9 = por %p128_p6, %p54_p2  ;;  %p442_p10 = scmp.ge.s32.totalorder %s777_s19, 1 }
  0x13   : > { %s1106_s25 = scalar_select %p865_p7, 1, 0 }
  0x14   : > { %s1107_s26 = scalar_select %p869_p8, 1, 0 }
  0x15   : > { %s1108_s27 = scalar_select %p873_p9, 1, 0 }
  0x16   : > { %p135_p11 = scmp.lt.s32.totalorder %s777_s19, 9  ;;  %s779_s29 = smov [#allocation5]  }
  0x17   : > { %s148_s30 = sshll.u32 %s779_s29, 4  ;;  %p515_p13 = scmp.lt.s32.totalorder %s777_s19, 8  ;;  %s149_s30 = int_to_ptr.vmem [resolvable:$true] %s148_s30 }
  0x18   : > { %p879_p12 = pnand %p442_p10, %p135_p11  ;;  %s780_s5 = smov [#allocation7]  }
  0x19   : > { %p888_p1 = pnand %p515_p13, %p859_p5  ;;  %s159_s6 = sshll.u32 %s780_s5, 4  ;;  %s898_s6 = int_to_ptr.vmem [resolvable:$true] %s159_s6 }
  0x1a   : > { %s1109_s28 = scalar_select %p879_p12, 1, 0 }
  0x1b   : > { %p498_p0 = pneg %p879_p12  ;;  %s1112_s1 = sld [smem:[#allocation14_spill]] }
  0x1c   : > { %s1110_s4 = scalar_select %p888_p1, 1, 0 }
  0x1d   : > { %p894_p2 = pnand %p498_p0, %p855_p3 }
  0x1f   : > { %p591_p5 = pneg %p894_p2 }
  0x21   : > { %s589_s10 = scalar_lea.hbm %s1112_s1, 16 }
  0x22   : > { %p590_p4 = scmp.ne.s32.totalorder %s1112_s1, %s589_s10  ;;  %p596_p11 = scmp.lt.u32.totalorder %s589_s10, %s1112_s1 }
  0x24   : > { %p592_p6 = pnand %p591_p5, %p590_p4 }
  0x26   : > { %p593_p10 = pneg %p592_p6 }
  0x28   : > { %p598_p13 = pnand %p596_p11, %p593_p10 }
  0x2a   : > { %601 = shalt.err (!%p598_p13)
}
  0x2b   : > { %s602_s29 = scalar_lea.vmem %s149_s30, 16  ;;  %s609_s5 = scalar_lea.vmem %s149_s30, 32 }
  0x2c   : > { %p603_p0 = scmp.ne.s32.totalorder %s149_s30, %s602_s29  ;;  %p610_p3 = scmp.lt.s32.totalorder %s149_s30, %s149_s30 }
  0x2d   : > { %p611_p7 = scmp.lt.s32.totalorder %s609_s5, %s602_s29 }
  0x2e   : > { %p605_p9 = pnand %p603_p0, %p591_p5 }
  0x2f   : > { %p612_p12 = por %p611_p7, %p610_p3 }
  0x30   : > { %p606_p8 = pneg %p605_p9 }
  0x32   : > { %p613_p1 = pnand %p612_p12, %p606_p8 }
  0x34   : > { %616 = shalt.err (!%p613_p1)
}
  0x35   : > { %501 = dma.hbm_to_vmem [thread:$0]  (!%p894_p2), %s1112_s1, 16, %s149_s30, [#allocation6]  }
  0x36   : > { %s1113_s2 = sld [smem:[#allocation15_spill]] }
  0x3c   : > { %s617_s20 = scalar_lea.hbm %s1113_s2, 16 }
  0x3d   : > { %p618_p9 = scmp.ne.s32.totalorder %s1113_s2, %s617_s20  ;;  %p624_p8 = scmp.lt.u32.totalorder %s617_s20, %s1113_s2 }
  0x3f   : > { %p620_p3 = pnand %p618_p9, %p591_p5 }
  0x41   : > { %p621_p7 = pneg %p620_p3 }
  0x43   : > { %p626_p12 = pnand %p624_p8, %p621_p7 }
  0x45   : > { %629 = shalt.err (!%p626_p12)
}
  0x46   : > { %s630_s30 = scalar_lea.vmem %s898_s6, 16  ;;  %s637_s8 = scalar_lea.vmem %s898_s6, 32 }
  0x47   : > { %p631_p1 = scmp.ne.s32.totalorder %s898_s6, %s630_s30  ;;  %p638_p10 = scmp.lt.s32.totalorder %s898_s6, %s898_s6 }
  0x48   : > { %p639_p11 = scmp.lt.s32.totalorder %s637_s8, %s630_s30 }
  0x49   : > { %p633_p4 = pnand %p631_p1, %p591_p5 }
  0x4a   : > { %p640_p13 = por %p639_p11, %p638_p10 }
  0x4b   : > { %p634_p6 = pneg %p633_p4 }
  0x4d   : > { %p641_p0 = pnand %p640_p13, %p634_p6 }
  0x4f   : > { %644 = shalt.err (!%p641_p0)
}
  0x50   : > { %504 = dma.hbm_to_vmem [thread:$0]  (!%p894_p2), %s1113_s2, 16, %s898_s6, [#allocation6]  }
  0x51   : > { %s29_s11 = sadd.s32 1, %s769_s17  ;;  %s32_s20 = sadd.s32 1, %s773_s18 }
  0x52   : > { %p30_p5 = scmp.ge.s32.totalorder %s29_s11, 4  ;;  %s170_s21 = sand.u32 1, %s757_s14  }
  0x53   : > { %s446_s24 = sshll.u32 %s170_s21, 5  ;;  %s465_s29 = sshll.u32 %s769_s17, 3 }
  0x54   : > { %s1130_s11 = smov (%p30_p5, %s29_s11), 0  ;;  %s1132_s20 = smov (!%p30_p5, %s32_s20), %s773_s18 }
  0x55   : > { %1114 = sst [smem:[#allocation13_spill]] %s1130_s11  ;;  %s37_s7 = ssub.s32 %s769_s17, %s1130_s11 }
  0x56   : > { %p34_p9 = scmp.ge.s32.totalorder %s1132_s20, 2  ;;  %s449_s5 = sshll.u32 %s773_s18, 5 }
  0x57   : > { %s174_s30 = scalar_lea.vmem [#allocation2], %s446_s24  ;;  %s181_s8 = sadd.s32 %s465_s29, %s449_s5 }
  0x58   : > { %s184_s6 = sshll.u32 %s174_s30, 4  ;;  %s1134_s20 = smov (%p34_p9, %s1132_s20), 0  ;;  %s960_s6 = int_to_ptr.vmem [resolvable:$true] %s184_s6 }
  0x59   : > { %s36_s9 = ssub.s32 %s773_s18, %s1134_s20  ;;  %s450_s10 = sshll.u32 %s181_s8, 6 }
  0x5a   : > { %s38_s22 = sor.u32 %s37_s7, %s36_s9  ;;  %s967_s11 = scalar_lea.hbm %s1089_s0, %s450_s10 }
  0x5b   : > { %p39_p2 = scmp.eq.s32.totalorder %s38_s22, 0  ;;  %s1115_s24 = sadd.s32 1, %s757_s14 }
  0x5c   : > { %s974_s17 = scalar_lea.sflag [#allocation3], %s170_s21  ;;  %s645_s29 = scalar_lea.hbm %s967_s11, 512 }
  0x5d   : > { %s972_s30 = scalar_select %p39_p2, %s757_s14, %s1115_s24  }
  0x5e   : > { %p646_p3 = scmp.ne.s32.totalorder %s967_s11, %s645_s29  ;;  %p1116_p7 = scmp.ne.s32.totalorder %s1110_s4, 0 }
  0x5f   : > { %s650_s7 = scalar_lea.hbm %s1089_s0, 4096  ;;  %p651_p4 = scmp.lt.u32.totalorder %s967_s11, %s1089_s0 }
  0x60   : > { %p647_p8 = pneg %p1116_p7  ;;  %p652_p6 = scmp.lt.u32.totalorder %s650_s7, %s645_s29 }
  0x61   : > { %p654_p11 = scmp.lt.u32.totalorder %s645_s29, %s967_s11 }
  0x62   : > { %p648_p12 = pnand %p647_p8, %p646_p3  ;;  %p653_p10 = por %p652_p6, %p651_p4 }
  0x64   : > { %p649_p1 = pneg %p648_p12  ;;  %p655_p13 = por %p654_p11, %p653_p10 }
  0x66   : > { %p656_p0 = pnand %p655_p13, %p649_p1 }
  0x68   : > { %659 = shalt.err (!%p656_p0)
}
  0x69   : > { %s660_s22 = scalar_lea.vmem %s960_s6, 512  ;;  %s781_s21 = smov [#allocation2]  }
  0x6a   : > { %p661_p5 = scmp.ne.s32.totalorder %s960_s6, %s660_s22  ;;  %s665_s9 = sshll.u32 %s781_s21, 4  ;;  %s666_s9 = int_to_ptr.vmem [resolvable:$false] %s665_s9 }
  0x6b   : > { %s667_s10 = scalar_lea.vmem %s666_s9, 1024  ;;  %p668_p3 = scmp.lt.s32.totalorder %s960_s6, %s666_s9 }
  0x6c   : > { %p663_p9 = pnand %p661_p5, %p647_p8  ;;  %p669_p12 = scmp.lt.s32.totalorder %s667_s10, %s660_s22 }
  0x6e   : > { %p664_p2 = pneg %p663_p9  ;;  %p670_p4 = por %p669_p12, %p668_p3 }
  0x70   : > { %p671_p6 = pnand %p670_p4, %p664_p2 }
  0x72   : > { %674 = shalt.err (!%p671_p6)
}
  0x73   : > { %s782_s24 = smov 64   ;;  %s783_s29 = smov 4  }
  0x74   : > { %508 = dma.hbm_to_vmem [thread:$0]  (!%p1116_p7), %s967_s11, 512, %s960_s6, %s974_s17, %s782_s24, %s782_s24, %s783_s29  }
  0x75   : > { %p1117_p8 = scmp.ne.s32.totalorder %s1109_s28, 0 }
  0x76   : > { %s1005_s1 = sand.u32 (!%p1117_p8), 1, %s753_s13   ;;  %p1118_p1 = scmp.ne.s32.totalorder (!%p1117_p8), %s1106_s25, 0 }
  0x77   : > { %196 = sbr.rel (%p1117_p8) target bundleno = 161 (0xa1), region = 32  ;;  %s452_s2 = sshll.u32 (!%p1117_p8), %s1005_s1, 5 }
  0x78   : > { %s199_s7 = scalar_lea.sflag (!%p1117_p8), [#allocation3], %s1005_s1  ;;  %s202_s5 = scalar_lea.vmem (!%p1117_p8), [#allocation2], %s452_s2 }
  0x7e   : > { %736 = dma.done.wait (%p1118_p1), %s199_s7, 512  }
  0x7f   : > { %738 = vsyncadd (%p1118_p1), %s199_s7, 4294966784  ;;  %p1119_p10 = scmp.ne.s32.totalorder %s1104_s23, 0 }
  0x81   : > { %740 = dma.done.wait (%p1119_p10), [#allocation6], 32  }
  0x82   : > { %742 = vsyncadd (%p1119_p10), [#allocation6], 4294967264  ;;  %v468_v0 = vld [vmem:[%s202_s5] sm:$0xff]   ;;  %vm305_vm0 = vcmask 523264   ;;  %v483_v4 = vld [vmem:[%s202_s5 + $0x8] sm:$0xff]   ;;  %s455_s17 = sshll.u32 %s1005_s1, 6 }
  0x83   : > { %v456_v1 = vld [vmem:[#allocation5] ss:$0 sm:$0xff]  ;;  %v469_v2 = vunpack.c.l.bf16 %v468_v0  ;;  %v470_v3 = vunpack.c.h.bf16 %v468_v0  ;;  %v484_v5 = vld [vmem:[%s202_s5 + $0x10] sm:$0xff]   ;;  %v485_v6 = vld [vmem:[%s202_s5 + $0x18] sm:$0xff]   ;;  %v473_v8 = vunpack.c.l.bf16 %v483_v4  ;;  %v474_v9 = vunpack.c.h.bf16 %v483_v4  ;;  %s466_s23 = sshll.u32 %s761_s15, 3  ;;  %s461_s25 = sshll.u32 %s765_s16, 5 }
  0x84   : > { %v457_v7 = vld [vmem:[#allocation7] ss:$0 sm:$0xff]  ;;  %v477_v10 = vunpack.c.l.bf16 %v484_v5  ;;  %v478_v11 = vunpack.c.h.bf16 %v484_v5  ;;  %v481_v14 = vunpack.c.l.bf16 %v485_v6  ;;  %v482_v15 = vunpack.c.h.bf16 %v485_v6  ;;  %s328_s28 = sadd.s32 %s466_s23, %s461_s25  ;;  %s232_s15 = scalar_lea.vmem [#allocation8], %s455_s17 }
  0x85   : > { %v258_v12 = vmul.f32 %v469_v2, %v456_v1  ;;  %v259_v13 = vmul.f32 %v470_v3, %v456_v1  ;;  %v260_v16 = vmul.f32 %v473_v8, %v456_v1  ;;  %v261_v17 = vmul.f32 %v474_v9, %v456_v1  ;;  %s331_s16 = sshll.u32 %s232_s15, 4  ;;  %s462_s4 = sshll.u32 %s328_s28, 7  ;;  %s1027_s16 = int_to_ptr.vmem [resolvable:$true] %s331_s16 }
  0x86   : > { %v262_v18 = vmul.f32 %v477_v10, %v456_v1  ;;  %v263_v19 = vmul.f32 %v478_v11, %v456_v1  ;;  %v264_v22 = vmul.f32 %v481_v14, %v456_v1  ;;  %v265_v23 = vmul.f32 %v482_v15, %v456_v1  ;;  %s1033_s8 = scalar_lea.hbm %s1092_s3, %s462_s4  ;;  %s315_s22 = scalar_lea.sflag [#allocation4], %s1005_s1 }
  0x87   : > { %v273_v20 = vadd.f32 %v457_v7, %v258_v12  ;;  %v274_v21 = vadd.f32 %v457_v7, %v259_v13  ;;  %v275_v24 = vadd.f32 %v457_v7, %v260_v16  ;;  %v276_v25 = vadd.f32 %v457_v7, %v261_v17  ;;  %s675_s21 = scalar_lea.vmem %s1027_s16, 1024  ;;  %p1120_p11 = scmp.ne.s32.totalorder %s1107_s26, 0 }
  0x88   : > { %v277_v26 = vadd.f32 %v457_v7, %v262_v18  ;;  %v278_v27 = vadd.f32 %v457_v7, %v263_v19  ;;  %v279_v39 = vadd.f32 %v457_v7, %v264_v22  ;;  %v280_v40 = vadd.f32 %v457_v7, %v265_v23  ;;  %p676_p7 = scmp.ne.s32.totalorder %s1027_s16, %s675_s21  ;;  %s784_s9 = smov [#allocation8]  }
  0x89   : > { %vm281_vm1 = vcmp.ge.f32.partialorder %v273_v20, 0.0  ;;  %v289_v28 = vmul.f32 0.2, %v273_v20  ;;  %vm282_vm2 = vcmp.ge.f32.partialorder %v274_v21, 0.0  ;;  %v290_v29 = vmul.f32 0.2, %v274_v21 }
  0x8a   : > { %vm283_vm3 = vcmp.ge.f32.partialorder %v275_v24, 0.0  ;;  %v291_v30 = vmul.f32 0.2, %v275_v24  ;;  %vm284_vm4 = vcmp.ge.f32.partialorder %v276_v25, 0.0  ;;  %v292_v31 = vmul.f32 0.2, %v276_v25  ;;  %p677_p13 = pnand %p676_p7, %p1120_p11 }
  0x8b   : > { %v297_v32 = vsel %vm281_vm1, %v273_v20, %v289_v28  ;;  %v298_v33 = vsel %vm282_vm2, %v274_v21, %v290_v29  ;;  %vm285_vm5 = vcmp.ge.f32.partialorder %v277_v26, 0.0  ;;  %v293_v34 = vmul.f32 0.2, %v277_v26  ;;  %s679_s10 = sshll.u32 %s784_s9, 4  ;;  %s680_s10 = int_to_ptr.vmem [resolvable:$false] %s679_s10 }
  0x8c   : > { %306 = vst.msk [vmem:[%s232_s15] sm:$0xff] %vm305_vm0, %v297_v32  ;;  %307 = vst.msk [vmem:[%s232_s15 + $0x8] sm:$0xff] %vm305_vm0, %v298_v33  ;;  %v299_v35 = vsel %vm283_vm3, %v275_v24, %v291_v30  ;;  %v300_v36 = vsel %vm284_vm4, %v276_v25, %v292_v31  ;;  %vm286_vm6 = vcmp.ge.f32.partialorder %v278_v27, 0.0  ;;  %v294_v37 = vmul.f32 0.2, %v278_v27  ;;  %p678_p0 = pneg %p677_p13  ;;  %s681_s24 = scalar_lea.vmem %s680_s10, 2048 }
  0x8d   : > { %308 = vst.msk [vmem:[%s232_s15 + $0x10] sm:$0xff] %vm305_vm0, %v299_v35  ;;  %309 = vst.msk [vmem:[%s232_s15 + $0x18] sm:$0xff] %vm305_vm0, %v300_v36  ;;  %v301_v38 = vsel %vm285_vm5, %v277_v26, %v293_v34  ;;  %vm287_vm7 = vcmp.ge.f32.partialorder %v279_v39, 0.0  ;;  %v295_v42 = vmul.f32 0.2, %v279_v39  ;;  %vm288_vm8 = vcmp.ge.f32.partialorder %v280_v40, 0.0  ;;  %p682_p5 = scmp.lt.s32.totalorder %s1027_s16, %s680_s10  ;;  %p683_p9 = scmp.lt.s32.totalorder %s681_s24, %s675_s21 }
  0x8e   : > { %310 = vst.msk [vmem:[%s232_s15 + $0x20] sm:$0xff] %vm305_vm0, %v301_v38  ;;  %v302_v41 = vsel %vm286_vm6, %v278_v27, %v294_v37  ;;  %v296_v43 = vmul.f32 0.2, %v280_v40 }
  0x8f   : > { %311 = vst.msk [vmem:[%s232_s15 + $0x28] sm:$0xff] %vm305_vm0, %v302_v41  ;;  %v303_v44 = vsel %vm287_vm7, %v279_v39, %v295_v42  ;;  %p684_p2 = por %p683_p9, %p682_p5 }
  0x90   : > { %v304_v45 = vsel %vm288_vm8, %v280_v40, %v296_v43  ;;  %312 = vst.msk [vmem:[%s232_s15 + $0x30] sm:$0xff] %vm305_vm0, %v303_v44 }
  0x91   : > { %313 = vst.msk [vmem:[%s232_s15 + $0x38] sm:$0xff] %vm305_vm0, %v304_v45  ;;  %p685_p3 = pnand %p684_p2, %p678_p0 }
  0x93   : > { %688 = shalt.err (!%p685_p3)
}
  0x94   : > { %s689_s29 = scalar_lea.hbm %s1033_s8, 1024  ;;  %s693_s5 = scalar_lea.hbm %s1092_s3, 8192 }
  0x95   : > { %p690_p12 = scmp.ne.s32.totalorder %s1033_s8, %s689_s29  ;;  %p694_p8 = scmp.lt.u32.totalorder %s1033_s8, %s1092_s3 }
  0x96   : > { %p695_p1 = scmp.lt.u32.totalorder %s693_s5, %s689_s29  ;;  %p697_p7 = scmp.lt.u32.totalorder %s689_s29, %s1033_s8 }
  0x97   : > { %p691_p4 = pnand %p690_p12, %p1120_p11 }
  0x98   : > { %p696_p10 = por %p695_p1, %p694_p8 }
  0x99   : > { %p692_p6 = pneg %p691_p4 }
  0x9a   : > { %p698_p13 = por %p697_p7, %p696_p10 }
  0x9c   : > { %p699_p0 = pnand %p698_p13, %p692_p6 }
  0x9e   : > { %702 = shalt.err (!%p699_p0)
}
  0x9f   : > { %s785_s25 = smov 128   ;;  %s786_s28 = smov 8  }
  0xa0   : > { %496 = dma.vmem_to_hbm [thread:$0]  (%p1120_p11), %s1027_s16, 1024, %s1033_s8, %s315_s22, %s785_s25, %s785_s25, %s786_s28  }
  0xa1 PF: > { %p518_p5 = scmp.ge.s32.totalorder %s777_s19, 2  ;;  %s346_s15 = sand.u32 1, %s749_s12  }
  0xa2   : > { %p1121_p9 = scmp.ne.s32.totalorder %s1108_s27, 0  ;;  %s347_s4 = scalar_lea.sflag [#allocation4], %s346_s15 }
  0xa4   : > { %p510_p2 = pnand %p518_p5, %p1121_p9 }
  0xa6   : > { %744 = dma.done.wait (!%p510_p2), %s347_s4, 1024  }
  0xa7   : > { %746 = vsyncadd (!%p510_p2), %s347_s4, 4294966272  ;;  %s20_s19 = sadd.s32 1, %s777_s19   ;;  %s1122_s15 = sld [smem:[#allocation12_spill]] }
  0xa8   : > { %p17_p3 = scmp.ge.s32.totalorder %s20_s19, 10   ;;  %s1123_s17 = sld [smem:[#allocation13_spill]] }
  0xa9   : > { %s1124_s12 = smov %s753_s13  ;;  %s1125_s13 = smov %s757_s14 }
  0xaa   : > { %s1126_s14 = smov %s972_s30  ;;  %s1127_s16 = smov %s773_s18 }
  0xab   : > { %s1128_s18 = smov %s1134_s20  ;;  %19 = sbr.rel (!%p17_p3) target bundleno = 11 (0xb), region = 85 }
  0xb2   :  { %352 = vsyncpa [#allocation3], 1 }
  0xb3   :  { %354 = vsyncpa [#allocation3 + $0x1], 1 }
  0xb4   :  { %355 = vsyncpa [#allocation6], 1 }
  0xb5   :  { %356 = vsyncpa [#allocation4], 1 }
  0xb6   :  { %358 = vsyncpa [#allocation4 + $0x1], 1 }

</bundles_post_ra>
